<compile_context>
chip_gen: v6e
topology: v6e:2x2x1
jax: 0.10.0
libtpu: 0.0.40
codegen_flags: <defaults>
</compile_context>

<pallas_src>
import jax
import jax.numpy as jnp
from jax import lax
from jax.experimental import pallas as pl
from jax.experimental.pallas import tpu as pltpu


def _pick_chunk(total, cap):
    """Largest divisor of `total` that is <= cap (so blocks tile exactly)."""
    c = max(1, min(total, cap))
    while total % c:
        c -= 1
    return c


# ----------------------------------------------------------------------------
# Kernel 1: hoisted input projection, grid = (direction, time-chunk), fully
# parallel.  gin[d, t] = x[t] @ Wih[d] + (b_ih[d] + b_hh[d])
#   x_ref  : (TT, B, Cin)   chronological time chunk
#   wih_ref: (1, Cin, 4H)   this direction's input->gates weight
#   b_ref  : (1, 1, 4H)     bias_ih + bias_hh
#   out_ref: (1, TT, B, 4H)
# ----------------------------------------------------------------------------
def in_proj_kernel(x_ref, wih_ref, b_ref, out_ref):
    TT, B, Cin = x_ref.shape
    G = wih_ref.shape[-1]
    x2d = x_ref[...].reshape(TT * B, Cin)
    gin = jnp.dot(x2d, wih_ref[0], preferred_element_type=jnp.float32) + b_ref[0]
    out_ref[0] = gin.reshape(TT, B, G)


def input_projection(x_tbc, wih, bias, *, time_chunk=128):
    """x_tbc: (T,B,Cin); wih:(2,Cin,4H); bias:(2,1,4H) -> (2,T,B,4H)."""
    T, B, Cin = x_tbc.shape
    G = wih.shape[-1]
    TT = _pick_chunk(T, time_chunk)
    NT = T // TT
    return pl.pallas_call(
        in_proj_kernel,
        out_shape=jax.ShapeDtypeStruct((2, T, B, G), jnp.float32),
        grid=(2, NT),
        in_specs=[
            pl.BlockSpec((TT, B, Cin), lambda d, t: (t, 0, 0)),
            pl.BlockSpec((1, Cin, G), lambda d, t: (d, 0, 0)),
            pl.BlockSpec((1, 1, G), lambda d, t: (d, 0, 0)),
        ],
        out_specs=pl.BlockSpec((1, TT, B, G), lambda d, t: (d, t, 0, 0)),
        compiler_params=pltpu.CompilerParams(
            dimension_semantics=("parallel", "parallel")),
    )(x_tbc, wih, bias)


# ----------------------------------------------------------------------------
# Kernel 2: bidirectional LSTM recurrence, grid = (direction, time-chunk).
#   gin_ref: (1, TT, B, 4H)  pre-projected gates for this direction/chunk
#   whh_ref: (1, H, 4H)      this direction's hidden->gates weight
#   out_ref: (1, TT, B, H)   hidden states for this direction/chunk
#   h_sc/c_sc : (B, H)       VMEM scratch carrying the recurrence across chunks
# Gate order matches PyTorch: i, f, g, o.
# ----------------------------------------------------------------------------
def lstm_recur_kernel(gin_ref, whh_ref, out_ref, h_sc, c_sc):
    _, TT, B, G = gin_ref.shape
    H = h_sc.shape[-1]
    d = pl.program_id(0)  # 0 = forward, 1 = backward

    # Reset the carried state at the first time-chunk of each direction.
    @pl.when(pl.program_id(1) == 0)
    def _():
        h_sc[...] = jnp.zeros_like(h_sc)
        c_sc[...] = jnp.zeros_like(c_sc)

    whh = whh_ref[0]  # (H, 4H), loaded once per chunk (hoisted out of the loop)

    def step(s, carry):
        # Forward walks the chunk 0..TT-1; backward walks TT-1..0.
        t = jnp.where(d == 0, s, TT - 1 - s)
        h = h_sc[...]
        c = c_sc[...]
        gates = gin_ref[0, t] + jnp.dot(h, whh, preferred_element_type=jnp.float32)
        i_g = jax.nn.sigmoid(gates[:, 0 * H:1 * H])
        f_g = jax.nn.sigmoid(gates[:, 1 * H:2 * H])
        g_g = jnp.tanh(gates[:, 2 * H:3 * H])
        o_g = jax.nn.sigmoid(gates[:, 3 * H:4 * H])
        c_new = f_g * c + i_g * g_g
        h_new = o_g * jnp.tanh(c_new)
        h_sc[...] = h_new
        c_sc[...] = c_new
        out_ref[0, t] = h_new
        return carry

    # Unroll short chunks so the LLO scheduler can overlap MXU push of step t
    # with the gate math of step t-1.
    lax.fori_loop(0, TT, step, 0, unroll=(TT <= 16))


def bidir_lstm_recurrence(gin, whh, *, time_chunk=128):
    """gin: (2,T,B,4H); whh:(2,H,4H) -> (2,T,B,H)."""
    _, T, B, G = gin.shape
    H = whh.shape[1]
    TT = _pick_chunk(T, time_chunk)
    NT = T // TT

    def gin_map(d, t):
        tb = jnp.where(d == 0, t, NT - 1 - t)
        return (d, tb, 0, 0)

    def out_map(d, t):
        tb = jnp.where(d == 0, t, NT - 1 - t)
        return (d, tb, 0, 0)

    return pl.pallas_call(
        lstm_recur_kernel,
        out_shape=jax.ShapeDtypeStruct((2, T, B, H), jnp.float32),
        grid=(2, NT),
        in_specs=[
            pl.BlockSpec((1, TT, B, G), gin_map),
            pl.BlockSpec((1, H, G), lambda d, t: (d, 0, 0)),
        ],
        out_specs=pl.BlockSpec((1, TT, B, H), out_map),
        scratch_shapes=[
            pltpu.VMEM((B, H), jnp.float32),  # h carry
            pltpu.VMEM((B, H), jnp.float32),  # c carry
        ],
        compiler_params=pltpu.CompilerParams(
            dimension_semantics=("parallel", "arbitrary")),
    )(gin, whh)


# ----------------------------------------------------------------------------
# Kernel 3: fused concat(fwd,bwd) + LayerNorm + Linear, tiled over time rows.
#   h_ref     : (2, RT, B, H)  both direction halves for RT time steps
#   gamma/beta: (1, 2H)
#   w_ref     : (2H, H)        fc weight (transposed PyTorch weight)
#   b_ref     : (1, H)
#   out_ref   : (RT, B, H)
# ----------------------------------------------------------------------------
def ln_fc_kernel(h_ref, gamma_ref, beta_ref, w_ref, b_ref, out_ref):
    RT, B, H = out_ref.shape
    hf = h_ref[0].reshape(RT * B, H)
    hb = h_ref[1].reshape(RT * B, H)
    x = jnp.concatenate([hf, hb], axis=-1)          # (RT*B, 2H) concat in VMEM
    mean = jnp.mean(x, axis=-1, keepdims=True)
    var = jnp.mean((x - mean) ** 2, axis=-1, keepdims=True)
    xn = (x - mean) * lax.rsqrt(var + 1e-5)
    y = xn * gamma_ref[...] + beta_ref[...]
    out = jnp.dot(y, w_ref[...], preferred_element_type=jnp.float32) + b_ref[...]
    out_ref[...] = out.reshape(RT, B, H)


def ln_fc(h_all, gamma, beta, fc_w, fc_b):
    """h_all: (2,T,B,H) -> (T,B,H)."""
    _, T, B, H = h_all.shape
    F = 2 * H
    RT = _pick_chunk(T, max(8, 512 // max(B, 1)))   # ~512 rows per tile
    NR = T // RT
    return pl.pallas_call(
        ln_fc_kernel,
        out_shape=jax.ShapeDtypeStruct((T, B, H), jnp.float32),
        grid=(NR,),
        in_specs=[
            pl.BlockSpec((2, RT, B, H), lambda i: (0, i, 0, 0)),
            pl.BlockSpec((1, F), lambda i: (0, 0)),
            pl.BlockSpec((1, F), lambda i: (0, 0)),
            pl.BlockSpec((F, H), lambda i: (0, 0)),
            pl.BlockSpec((1, H), lambda i: (0, 0)),
        ],
        out_specs=pl.BlockSpec((RT, B, H), lambda i: (i, 0, 0)),
        compiler_params=pltpu.CompilerParams(dimension_semantics=("parallel",)),
    )(h_all, gamma, beta, fc_w, fc_b)


# ----------------------------------------------------------------------------
# Full module forward (bidirectional LSTM -> LayerNorm -> Linear -> Dropout=id)
# ----------------------------------------------------------------------------
@jax.jit
def lstm_cell_forward(x_btc, params):
    B, T, Cin = x_btc.shape
    x_tbc = jnp.transpose(x_btc, (1, 0, 2))                        # (T, B, Cin)
    gin = input_projection(x_tbc, params["wih"], params["b"])      # (2, T, B, 4H)
    h_all = bidir_lstm_recurrence(gin, params["whh"])              # (2, T, B, H)
    y_tbh = ln_fc(h_all, params["ln_g"], params["ln_b"],
                  params["fc_w"], params["fc_b"])                  # (T, B, H)
    # dropout: identity in eval mode
    return jnp.transpose(y_tbh, (1, 0, 2))                         # (B, T, H)


def init_params(key, in_ch, out_ch):
    """Deterministic synthetic parameters matching nn.LSTM / LayerNorm / Linear shapes."""
    H = out_ch
    G = 4 * H
    k_lstm = 1.0 / jnp.sqrt(jnp.float32(H))
    keys = jax.random.split(key, 10)

    def u(kk, shape, bound):
        return jax.random.uniform(kk, shape, jnp.float32, -bound, bound)

    # PyTorch stores weight_ih as (4H, Cin); we keep the transposed (Cin, 4H),
    # stacked along the direction axis (0 = forward, 1 = backward).
    wih = jnp.stack([u(keys[0], (in_ch, G), k_lstm),
                     u(keys[1], (in_ch, G), k_lstm)])              # (2, Cin, 4H)
    whh = jnp.stack([u(keys[2], (H, G), k_lstm),
                     u(keys[3], (H, G), k_lstm)])                  # (2, H, 4H)
    b = jnp.stack([u(keys[4], (1, G), k_lstm) + u(keys[5], (1, G), k_lstm),
                   u(keys[6], (1, G), k_lstm) + u(keys[7], (1, G), k_lstm)])  # (2,1,4H)

    F = 2 * H
    ln_g = jnp.ones((1, F), jnp.float32)
    ln_b = jnp.zeros((1, F), jnp.float32)
    k_fc = 1.0 / jnp.sqrt(jnp.float32(F))
    fc_w = u(keys[8], (F, H), k_fc)    # transposed (out,in) -> (in,out)
    fc_b = u(keys[9], (1, H), k_fc)

    return dict(wih=wih, whh=whh, b=b, ln_g=ln_g, ln_b=ln_b, fc_w=fc_w, fc_b=fc_b)


if __name__ == "__main__":
    B, T, in_ch, out_ch = 2, 8, 16, 32
    key = jax.random.PRNGKey(0)
    k_x, k_p = jax.random.split(key)
    x = jax.random.normal(k_x, (B, T, in_ch), jnp.float32)
    params = init_params(k_p, in_ch, out_ch)

    out = lstm_cell_forward(x, params)
    jax.block_until_ready(out)
    assert out.shape == (B, T, out_ch), out.shape
    print("KERNEL_OK")
</pallas_src>

<mosaic_0001>
module attributes {stable_mosaic.version = 11 : i64} {
  func.func @in_proj_kernel(%arg0: i32, %arg1: i32, %arg2: memref<8x2x16xf32, #tpu.memory_space<vmem>>, %arg3: memref<1x16x128xf32, #tpu.memory_space<vmem>>, %arg4: memref<1x1x128xf32, #tpu.memory_space<vmem>>, %arg5: memref<1x8x2x128xf32, #tpu.memory_space<vmem>>) attributes {dimension_semantics = [#tpu.dimension_semantics<parallel>, #tpu.dimension_semantics<parallel>], iteration_bounds = array<i64: 2, 1>, scalar_prefetch = 0 : i64, scratch_operands = 0 : i64, tpu.core_type = #tpu.core_type<tc>, window_params = [{transform_indices = @transform_0, window_bounds = array<i64: 8, 2, 16>}, {transform_indices = @transform_1, window_bounds = array<i64: 1, 16, 128>}, {transform_indices = @transform_2, window_bounds = array<i64: 1, 1, 128>}, {transform_indices = @transform_3, window_bounds = array<i64: 1, 8, 2, 128>}]} {
    %c0 = arith.constant 0 : index
    %c0_0 = arith.constant 0 : index
    %c0_1 = arith.constant 0 : index
    %0 = vector.load %arg2[%c0, %c0_0, %c0_1] : memref<8x2x16xf32, #tpu.memory_space<vmem>>, vector<8x2x16xf32>
    %1 = vector.shape_cast %0 : vector<8x2x16xf32> to vector<16x16xf32>
    %c0_2 = arith.constant 0 : index
    %c0_3 = arith.constant 0 : index
    %c0_4 = arith.constant 0 : index
    %2 = vector.load %arg3[%c0_2, %c0_3, %c0_4] : memref<1x16x128xf32, #tpu.memory_space<vmem>>, vector<1x16x128xf32>
    %3 = vector.shape_cast %2 : vector<1x16x128xf32> to vector<16x128xf32>
    %cst = arith.constant dense<0.000000e+00> : vector<16x128xf32>
    %4 = tpu.matmul %1, %3, %cst {dimension_numbers = #tpu.dot_dimension_numbers<[1], [0], [0], [1], [0, 0, 1, 1], [], []>} : vector<16x16xf32>, vector<16x128xf32>, vector<16x128xf32> -> vector<16x128xf32>
    %c0_5 = arith.constant 0 : index
    %c0_6 = arith.constant 0 : index
    %c0_7 = arith.constant 0 : index
    %5 = vector.load %arg4[%c0_5, %c0_6, %c0_7] : memref<1x1x128xf32, #tpu.memory_space<vmem>>, vector<1x1x128xf32>
    %6 = vector.shape_cast %5 : vector<1x1x128xf32> to vector<1x128xf32>
    %7 = vector.broadcast %6 : vector<1x128xf32> to vector<16x128xf32>
    %8 = arith.addf %4, %7 : vector<16x128xf32>
    %9 = vector.shape_cast %8 : vector<16x128xf32> to vector<8x2x128xf32>
    %c0_8 = arith.constant 0 : index
    %c0_9 = arith.constant 0 : index
    %c0_10 = arith.constant 0 : index
    %c0_11 = arith.constant 0 : index
    %10 = vector.load %arg5[%c0_8, %c0_9, %c0_10, %c0_11] : memref<1x8x2x128xf32, #tpu.memory_space<vmem>>, vector<1x8x2x128xf32>
    %11 = vector.shape_cast %10 : vector<1x8x2x128xf32> to vector<8x2x128xf32>
    %12 = vector.shape_cast %9 : vector<8x2x128xf32> to vector<1x8x2x128xf32>
    tpu.vector_store %arg5[%c0_8, %c0_9, %c0_10, %c0_11], %12 {strides = array<i32>} : memref<1x8x2x128xf32, #tpu.memory_space<vmem>>, vector<1x8x2x128xf32>,
    return
  }
  func.func @transform_0(%arg0: i32, %arg1: i32) -> (i32, i32, i32) {
    %c0_i32 = arith.constant 0 : i32
    %c0_i32_0 = arith.constant 0 : i32
    %c0_i32_1 = arith.constant 0 : i32
    return %arg1, %c0_i32, %c0_i32_0 : i32, i32, i32
  }
  func.func @transform_1(%arg0: i32, %arg1: i32) -> (i32, i32, i32) {
    %c0_i32 = arith.constant 0 : i32
    %c0_i32_0 = arith.constant 0 : i32
    %c0_i32_1 = arith.constant 0 : i32
    return %arg0, %c0_i32, %c0_i32_0 : i32, i32, i32
  }
  func.func @transform_2(%arg0: i32, %arg1: i32) -> (i32, i32, i32) {
    %c0_i32 = arith.constant 0 : i32
    %c0_i32_0 = arith.constant 0 : i32
    %c0_i32_1 = arith.constant 0 : i32
    return %arg0, %c0_i32, %c0_i32_0 : i32, i32, i32
  }
  func.func @transform_3(%arg0: i32, %arg1: i32) -> (i32, i32, i32, i32) {
    %c0_i32 = arith.constant 0 : i32
    %c0_i32_0 = arith.constant 0 : i32
    %c0_i32_1 = arith.constant 0 : i32
    return %arg0, %arg1, %c0_i32, %c0_i32_0 : i32, i32, i32, i32
  }
}

module attributes {stable_mosaic.version = 11 : i64} {
  func.func @lstm_recur_kernel(%arg0: i32, %arg1: i32, %arg2: memref<1x8x2x128xf32, #tpu.memory_space<vmem>>, %arg3: memref<1x32x128xf32, #tpu.memory_space<vmem>>, %arg4: memref<1x8x2x32xf32, #tpu.memory_space<vmem>>, %arg5: memref<2x32xf32, #tpu.memory_space<vmem>>, %arg6: memref<2x32xf32, #tpu.memory_space<vmem>>) attributes {dimension_semantics = [#tpu.dimension_semantics<parallel>, #tpu.dimension_semantics<arbitrary>], iteration_bounds = array<i64: 2, 1>, scalar_prefetch = 0 : i64, scratch_operands = 2 : i64, tpu.core_type = #tpu.core_type<tc>, window_params = [{transform_indices = @transform_0, window_bounds = array<i64: 1, 8, 2, 128>}, {transform_indices = @transform_1, window_bounds = array<i64: 1, 32, 128>}, {transform_indices = @transform_2, window_bounds = array<i64: 1, 8, 2, 32>}]} {
    %c0_i32 = arith.constant 0 : i32
    %0 = arith.cmpi eq, %arg1, %c0_i32 : i32
    %1 = arith.extui %0 : i1 to i32
    %c0_i32_0 = arith.constant 0 : i32
    %2 = arith.cmpi ne, %1, %c0_i32_0 : i32
    scf.if %2 {
      %cst_163 = arith.constant 0.000000e+00 : f32
      %333 = vector.broadcast %cst_163 : f32 to vector<2x32xf32>
      %c0_164 = arith.constant 0 : index
      %c0_165 = arith.constant 0 : index
      %334 = vector.load %arg5[%c0_164, %c0_165] : memref<2x32xf32, #tpu.memory_space<vmem>>, vector<2x32xf32>
      tpu.vector_store %arg5[%c0_164, %c0_165], %333 {strides = array<i32>} : memref<2x32xf32, #tpu.memory_space<vmem>>, vector<2x32xf32>,
      %cst_166 = arith.constant 0.000000e+00 : f32
      %335 = vector.broadcast %cst_166 : f32 to vector<2x32xf32>
      %c0_167 = arith.constant 0 : index
      %c0_168 = arith.constant 0 : index
      %336 = vector.load %arg6[%c0_167, %c0_168] : memref<2x32xf32, #tpu.memory_space<vmem>>, vector<2x32xf32>
      tpu.vector_store %arg6[%c0_167, %c0_168], %335 {strides = array<i32>} : memref<2x32xf32, #tpu.memory_space<vmem>>, vector<2x32xf32>,
    } else {
    }
    %c0 = arith.constant 0 : index
    %c0_1 = arith.constant 0 : index
    %c0_2 = arith.constant 0 : index
    %3 = vector.load %arg3[%c0, %c0_1, %c0_2] : memref<1x32x128xf32, #tpu.memory_space<vmem>>, vector<1x32x128xf32>
    %4 = vector.shape_cast %3 : vector<1x32x128xf32> to vector<32x128xf32>
    %c0_i32_3 = arith.constant 0 : i32
    %c0_i32_4 = arith.constant 0 : i32
    %5 = arith.cmpi eq, %arg0, %c0_i32_4 : i32
    %c7_i32 = arith.constant 7 : i32
    %6 = arith.subi %c7_i32, %c0_i32_3 : i32
    %7 = arith.select %5, %c0_i32_3, %6 : i32
    %c0_5 = arith.constant 0 : index
    %c0_6 = arith.constant 0 : index
    %8 = vector.load %arg5[%c0_5, %c0_6] : memref<2x32xf32, #tpu.memory_space<vmem>>, vector<2x32xf32>
    %c0_7 = arith.constant 0 : index
    %c0_8 = arith.constant 0 : index
    %9 = vector.load %arg6[%c0_7, %c0_8] : memref<2x32xf32, #tpu.memory_space<vmem>>, vector<2x32xf32>
    %c0_9 = arith.constant 0 : index
    %10 = arith.index_cast %7 : i32 to index
    %c0_10 = arith.constant 0 : index
    %c0_11 = arith.constant 0 : index
    %11 = vector.load %arg2[%c0_9, %10, %c0_10, %c0_11] : memref<1x8x2x128xf32, #tpu.memory_space<vmem>>, vector<1x1x2x128xf32>
    %12 = vector.shape_cast %11 : vector<1x1x2x128xf32> to vector<2x128xf32>
    %cst = arith.constant dense<0.000000e+00> : vector<2x128xf32>
    %13 = tpu.matmul %8, %4, %cst {dimension_numbers = #tpu.dot_dimension_numbers<[1], [0], [0], [1], [0, 0, 1, 1], [], []>} : vector<2x32xf32>, vector<32x128xf32>, vector<2x128xf32> -> vector<2x128xf32>
    %14 = arith.addf %12, %13 : vector<2x128xf32>
    %15 = vector.extract_strided_slice %14 {offsets = [0, 0], sizes = [2, 32], strides = [1, 1]} : vector<2x128xf32> to vector<2x32xf32>
    %16 = arith.negf %15 : vector<2x32xf32>
    %17 = math.exp %16 : vector<2x32xf32>
    %cst_12 = arith.constant 1.000000e+00 : f32
    %18 = vector.broadcast %cst_12 : f32 to vector<2x32xf32>
    %19 = arith.addf %18, %17 : vector<2x32xf32>
    %20 = arith.divf %18, %19 : vector<2x32xf32>
    %21 = vector.extract_strided_slice %14 {offsets = [0, 32], sizes = [2, 32], strides = [1, 1]} : vector<2x128xf32> to vector<2x32xf32>
    %22 = arith.negf %21 : vector<2x32xf32>
    %23 = math.exp %22 : vector<2x32xf32>
    %cst_13 = arith.constant 1.000000e+00 : f32
    %24 = vector.broadcast %cst_13 : f32 to vector<2x32xf32>
    %25 = arith.addf %24, %23 : vector<2x32xf32>
    %26 = arith.divf %24, %25 : vector<2x32xf32>
    %27 = vector.extract_strided_slice %14 {offsets = [0, 64], sizes = [2, 32], strides = [1, 1]} : vector<2x128xf32> to vector<2x32xf32>
    %28 = math.tanh %27 : vector<2x32xf32>
    %29 = vector.extract_strided_slice %14 {offsets = [0, 96], sizes = [2, 32], strides = [1, 1]} : vector<2x128xf32> to vector<2x32xf32>
    %30 = arith.negf %29 : vector<2x32xf32>
    %31 = math.exp %30 : vector<2x32xf32>
    %cst_14 = arith.constant 1.000000e+00 : f32
    %32 = vector.broadcast %cst_14 : f32 to vector<2x32xf32>
    %33 = arith.addf %32, %31 : vector<2x32xf32>
    %34 = arith.divf %32, %33 : vector<2x32xf32>
    %35 = arith.mulf %26, %9 : vector<2x32xf32>
    %36 = arith.mulf %20, %28 : vector<2x32xf32>
    %37 = arith.addf %35, %36 : vector<2x32xf32>
    %38 = math.tanh %37 : vector<2x32xf32>
    %39 = arith.mulf %34, %38 : vector<2x32xf32>
    %c0_15 = arith.constant 0 : index
    %c0_16 = arith.constant 0 : index
    %40 = vector.load %arg5[%c0_15, %c0_16] : memref<2x32xf32, #tpu.memory_space<vmem>>, vector<2x32xf32>
    tpu.vector_store %arg5[%c0_15, %c0_16], %39 {strides = array<i32>} : memref<2x32xf32, #tpu.memory_space<vmem>>, vector<2x32xf32>,
    %c0_17 = arith.constant 0 : index
    %c0_18 = arith.constant 0 : index
    %41 = vector.load %arg6[%c0_17, %c0_18] : memref<2x32xf32, #tpu.memory_space<vmem>>, vector<2x32xf32>
    tpu.vector_store %arg6[%c0_17, %c0_18], %37 {strides = array<i32>} : memref<2x32xf32, #tpu.memory_space<vmem>>, vector<2x32xf32>,
    %c0_19 = arith.constant 0 : index
    %42 = arith.index_cast %7 : i32 to index
    %c0_20 = arith.constant 0 : index
    %c0_21 = arith.constant 0 : index
    %43 = vector.load %arg4[%c0_19, %42, %c0_20, %c0_21] : memref<1x8x2x32xf32, #tpu.memory_space<vmem>>, vector<1x1x2x32xf32>
    %44 = vector.shape_cast %43 : vector<1x1x2x32xf32> to vector<2x32xf32>
    %45 = vector.shape_cast %39 : vector<2x32xf32> to vector<1x1x2x32xf32>
    tpu.vector_store %arg4[%c0_19, %42, %c0_20, %c0_21], %45 {strides = array<i32>} : memref<1x8x2x32xf32, #tpu.memory_space<vmem>>, vector<1x1x2x32xf32>,
    %c1_i32 = arith.constant 1 : i32
    %c0_i32_22 = arith.constant 0 : i32
    %46 = arith.cmpi eq, %arg0, %c0_i32_22 : i32
    %c7_i32_23 = arith.constant 7 : i32
    %47 = arith.subi %c7_i32_23, %c1_i32 : i32
    %48 = arith.select %46, %c1_i32, %47 : i32
    %c0_24 = arith.constant 0 : index
    %c0_25 = arith.constant 0 : index
    %49 = vector.load %arg5[%c0_24, %c0_25] : memref<2x32xf32, #tpu.memory_space<vmem>>, vector<2x32xf32>
    %c0_26 = arith.constant 0 : index
    %c0_27 = arith.constant 0 : index
    %50 = vector.load %arg6[%c0_26, %c0_27] : memref<2x32xf32, #tpu.memory_space<vmem>>, vector<2x32xf32>
    %c0_28 = arith.constant 0 : index
    %51 = arith.index_cast %48 : i32 to index
    %c0_29 = arith.constant 0 : index
    %c0_30 = arith.constant 0 : index
    %52 = vector.load %arg2[%c0_28, %51, %c0_29, %c0_30] : memref<1x8x2x128xf32, #tpu.memory_space<vmem>>, vector<1x1x2x128xf32>
    %53 = vector.shape_cast %52 : vector<1x1x2x128xf32> to vector<2x128xf32>
    %cst_31 = arith.constant dense<0.000000e+00> : vector<2x128xf32>
    %54 = tpu.matmul %49, %4, %cst_31 {dimension_numbers = #tpu.dot_dimension_numbers<[1], [0], [0], [1], [0, 0, 1, 1], [], []>} : vector<2x32xf32>, vector<32x128xf32>, vector<2x128xf32> -> vector<2x128xf32>
    %55 = arith.addf %53, %54 : vector<2x128xf32>
    %56 = vector.extract_strided_slice %55 {offsets = [0, 0], sizes = [2, 32], strides = [1, 1]} : vector<2x128xf32> to vector<2x32xf32>
    %57 = arith.negf %56 : vector<2x32xf32>
    %58 = math.exp %57 : vector<2x32xf32>
    %cst_32 = arith.constant 1.000000e+00 : f32
    %59 = vector.broadcast %cst_32 : f32 to vector<2x32xf32>
    %60 = arith.addf %59, %58 : vector<2x32xf32>
    %61 = arith.divf %59, %60 : vector<2x32xf32>
    %62 = vector.extract_strided_slice %55 {offsets = [0, 32], sizes = [2, 32], strides = [1, 1]} : vector<2x128xf32> to vector<2x32xf32>
    %63 = arith.negf %62 : vector<2x32xf32>
    %64 = math.exp %63 : vector<2x32xf32>
    %cst_33 = arith.constant 1.000000e+00 : f32
    %65 = vector.broadcast %cst_33 : f32 to vector<2x32xf32>
    %66 = arith.addf %65, %64 : vector<2x32xf32>
    %67 = arith.divf %65, %66 : vector<2x32xf32>
    %68 = vector.extract_strided_slice %55 {offsets = [0, 64], sizes = [2, 32], strides = [1, 1]} : vector<2x128xf32> to vector<2x32xf32>
    %69 = math.tanh %68 : vector<2x32xf32>
    %70 = vector.extract_strided_slice %55 {offsets = [0, 96], sizes = [2, 32], strides = [1, 1]} : vector<2x128xf32> to vector<2x32xf32>
    %71 = arith.negf %70 : vector<2x32xf32>
    %72 = math.exp %71 : vector<2x32xf32>
    %cst_34 = arith.constant 1.000000e+00 : f32
    %73 = vector.broadcast %cst_34 : f32 to vector<2x32xf32>
    %74 = arith.addf %73, %72 : vector<2x32xf32>
    %75 = arith.divf %73, %74 : vector<2x32xf32>
    %76 = arith.mulf %67, %50 : vector<2x32xf32>
    %77 = arith.mulf %61, %69 : vector<2x32xf32>
    %78 = arith.addf %76, %77 : vector<2x32xf32>
    %79 = math.tanh %78 : vector<2x32xf32>
    %80 = arith.mulf %75, %79 : vector<2x32xf32>
    %c0_35 = arith.constant 0 : index
    %c0_36 = arith.constant 0 : index
    %81 = vector.load %arg5[%c0_35, %c0_36] : memref<2x32xf32, #tpu.memory_space<vmem>>, vector<2x32xf32>
    tpu.vector_store %arg5[%c0_35, %c0_36], %80 {strides = array<i32>} : memref<2x32xf32, #tpu.memory_space<vmem>>, vector<2x32xf32>,
    %c0_37 = arith.constant 0 : index
    %c0_38 = arith.constant 0 : index
    %82 = vector.load %arg6[%c0_37, %c0_38] : memref<2x32xf32, #tpu.memory_space<vmem>>, vector<2x32xf32>
    tpu.vector_store %arg6[%c0_37, %c0_38], %78 {strides = array<i32>} : memref<2x32xf32, #tpu.memory_space<vmem>>, vector<2x32xf32>,
    %c0_39 = arith.constant 0 : index
    %83 = arith.index_cast %48 : i32 to index
    %c0_40 = arith.constant 0 : index
    %c0_41 = arith.constant 0 : index
    %84 = vector.load %arg4[%c0_39, %83, %c0_40, %c0_41] : memref<1x8x2x32xf32, #tpu.memory_space<vmem>>, vector<1x1x2x32xf32>
    %85 = vector.shape_cast %84 : vector<1x1x2x32xf32> to vector<2x32xf32>
    %86 = vector.shape_cast %80 : vector<2x32xf32> to vector<1x1x2x32xf32>
    tpu.vector_store %arg4[%c0_39, %83, %c0_40, %c0_41], %86 {strides = array<i32>} : memref<1x8x2x32xf32, #tpu.memory_space<vmem>>, vector<1x1x2x32xf32>,
    %c2_i32 = arith.constant 2 : i32
    %c0_i32_42 = arith.constant 0 : i32
    %87 = arith.cmpi eq, %arg0, %c0_i32_42 : i32
    %c7_i32_43 = arith.constant 7 : i32
    %88 = arith.subi %c7_i32_43, %c2_i32 : i32
    %89 = arith.select %87, %c2_i32, %88 : i32
    %c0_44 = arith.constant 0 : index
    %c0_45 = arith.constant 0 : index
    %90 = vector.load %arg5[%c0_44, %c0_45] : memref<2x32xf32, #tpu.memory_space<vmem>>, vector<2x32xf32>
    %c0_46 = arith.constant 0 : index
    %c0_47 = arith.constant 0 : index
    %91 = vector.load %arg6[%c0_46, %c0_47] : memref<2x32xf32, #tpu.memory_space<vmem>>, vector<2x32xf32>
    %c0_48 = arith.constant 0 : index
    %92 = arith.index_cast %89 : i32 to index
    %c0_49 = arith.constant 0 : index
    %c0_50 = arith.constant 0 : index
    %93 = vector.load %arg2[%c0_48, %92, %c0_49, %c0_50] : memref<1x8x2x128xf32, #tpu.memory_space<vmem>>, vector<1x1x2x128xf32>
    %94 = vector.shape_cast %93 : vector<1x1x2x128xf32> to vector<2x128xf32>
    %cst_51 = arith.constant dense<0.000000e+00> : vector<2x128xf32>
    %95 = tpu.matmul %90, %4, %cst_51 {dimension_numbers = #tpu.dot_dimension_numbers<[1], [0], [0], [1], [0, 0, 1, 1], [], []>} : vector<2x32xf32>, vector<32x128xf32>, vector<2x128xf32> -> vector<2x128xf32>
    %96 = arith.addf %94, %95 : vector<2x128xf32>
    %97 = vector.extract_strided_slice %96 {offsets = [0, 0], sizes = [2, 32], strides = [1, 1]} : vector<2x128xf32> to vector<2x32xf32>
    %98 = arith.negf %97 : vector<2x32xf32>
    %99 = math.exp %98 : vector<2x32xf32>
    %cst_52 = arith.constant 1.000000e+00 : f32
    %100 = vector.broadcast %cst_52 : f32 to vector<2x32xf32>
    %101 = arith.addf %100, %99 : vector<2x32xf32>
    %102 = arith.divf %100, %101 : vector<2x32xf32>
    %103 = vector.extract_strided_slice %96 {offsets = [0, 32], sizes = [2, 32], strides = [1, 1]} : vector<2x128xf32> to vector<2x32xf32>
    %104 = arith.negf %103 : vector<2x32xf32>
    %105 = math.exp %104 : vector<2x32xf32>
    %cst_53 = arith.constant 1.000000e+00 : f32
    %106 = vector.broadcast %cst_53 : f32 to vector<2x32xf32>
    %107 = arith.addf %106, %105 : vector<2x32xf32>
    %108 = arith.divf %106, %107 : vector<2x32xf32>
    %109 = vector.extract_strided_slice %96 {offsets = [0, 64], sizes = [2, 32], strides = [1, 1]} : vector<2x128xf32> to vector<2x32xf32>
    %110 = math.tanh %109 : vector<2x32xf32>
    %111 = vector.extract_strided_slice %96 {offsets = [0, 96], sizes = [2, 32], strides = [1, 1]} : vector<2x128xf32> to vector<2x32xf32>
    %112 = arith.negf %111 : vector<2x32xf32>
    %113 = math.exp %112 : vector<2x32xf32>
    %cst_54 = arith.constant 1.000000e+00 : f32
    %114 = vector.broadcast %cst_54 : f32 to vector<2x32xf32>
    %115 = arith.addf %114, %113 : vector<2x32xf32>
    %116 = arith.divf %114, %115 : vector<2x32xf32>
    %117 = arith.mulf %108, %91 : vector<2x32xf32>
    %118 = arith.mulf %102, %110 : vector<2x32xf32>
    %119 = arith.addf %117, %118 : vector<2x32xf32>
    %120 = math.tanh %119 : vector<2x32xf32>
    %121 = arith.mulf %116, %120 : vector<2x32xf32>
    %c0_55 = arith.constant 0 : index
    %c0_56 = arith.constant 0 : index
    %122 = vector.load %arg5[%c0_55, %c0_56] : memref<2x32xf32, #tpu.memory_space<vmem>>, vector<2x32xf32>
    tpu.vector_store %arg5[%c0_55, %c0_56], %121 {strides = array<i32>} : memref<2x32xf32, #tpu.memory_space<vmem>>, vector<2x32xf32>,
    %c0_57 = arith.constant 0 : index
    %c0_58 = arith.constant 0 : index
    %123 = vector.load %arg6[%c0_57, %c0_58] : memref<2x32xf32, #tpu.memory_space<vmem>>, vector<2x32xf32>
    tpu.vector_store %arg6[%c0_57, %c0_58], %119 {strides = array<i32>} : memref<2x32xf32, #tpu.memory_space<vmem>>, vector<2x32xf32>,
    %c0_59 = arith.constant 0 : index
    %124 = arith.index_cast %89 : i32 to index
    %c0_60 = arith.constant 0 : index
    %c0_61 = arith.constant 0 : index
    %125 = vector.load %arg4[%c0_59, %124, %c0_60, %c0_61] : memref<1x8x2x32xf32, #tpu.memory_space<vmem>>, vector<1x1x2x32xf32>
    %126 = vector.shape_cast %125 : vector<1x1x2x32xf32> to vector<2x32xf32>
    %127 = vector.shape_cast %121 : vector<2x32xf32> to vector<1x1x2x32xf32>
    tpu.vector_store %arg4[%c0_59, %124, %c0_60, %c0_61], %127 {strides = array<i32>} : memref<1x8x2x32xf32, #tpu.memory_space<vmem>>, vector<1x1x2x32xf32>,
    %c3_i32 = arith.constant 3 : i32
    %c0_i32_62 = arith.constant 0 : i32
    %128 = arith.cmpi eq, %arg0, %c0_i32_62 : i32
    %c7_i32_63 = arith.constant 7 : i32
    %129 = arith.subi %c7_i32_63, %c3_i32 : i32
    %130 = arith.select %128, %c3_i32, %129 : i32
    %c0_64 = arith.constant 0 : index
    %c0_65 = arith.constant 0 : index
    %131 = vector.load %arg5[%c0_64, %c0_65] : memref<2x32xf32, #tpu.memory_space<vmem>>, vector<2x32xf32>
    %c0_66 = arith.constant 0 : index
    %c0_67 = arith.constant 0 : index
    %132 = vector.load %arg6[%c0_66, %c0_67] : memref<2x32xf32, #tpu.memory_space<vmem>>, vector<2x32xf32>
    %c0_68 = arith.constant 0 : index
    %133 = arith.index_cast %130 : i32 to index
    %c0_69 = arith.constant 0 : index
    %c0_70 = arith.constant 0 : index
    %134 = vector.load %arg2[%c0_68, %133, %c0_69, %c0_70] : memref<1x8x2x128xf32, #tpu.memory_space<vmem>>, vector<1x1x2x128xf32>
    %135 = vector.shape_cast %134 : vector<1x1x2x128xf32> to vector<2x128xf32>
    %cst_71 = arith.constant dense<0.000000e+00> : vector<2x128xf32>
    %136 = tpu.matmul %131, %4, %cst_71 {dimension_numbers = #tpu.dot_dimension_numbers<[1], [0], [0], [1], [0, 0, 1, 1], [], []>} : vector<2x32xf32>, vector<32x128xf32>, vector<2x128xf32> -> vector<2x128xf32>
    %137 = arith.addf %135, %136 : vector<2x128xf32>
    %138 = vector.extract_strided_slice %137 {offsets = [0, 0], sizes = [2, 32], strides = [1, 1]} : vector<2x128xf32> to vector<2x32xf32>
    %139 = arith.negf %138 : vector<2x32xf32>
    %140 = math.exp %139 : vector<2x32xf32>
    %cst_72 = arith.constant 1.000000e+00 : f32
    %141 = vector.broadcast %cst_72 : f32 to vector<2x32xf32>
    %142 = arith.addf %141, %140 : vector<2x32xf32>
    %143 = arith.divf %141, %142 : vector<2x32xf32>
    %144 = vector.extract_strided_slice %137 {offsets = [0, 32], sizes = [2, 32], strides = [1, 1]} : vector<2x128xf32> to vector<2x32xf32>
    %145 = arith.negf %144 : vector<2x32xf32>
    %146 = math.exp %145 : vector<2x32xf32>
    %cst_73 = arith.constant 1.000000e+00 : f32
    %147 = vector.broadcast %cst_73 : f32 to vector<2x32xf32>
    %148 = arith.addf %147, %146 : vector<2x32xf32>
    %149 = arith.divf %147, %148 : vector<2x32xf32>
    %150 = vector.extract_strided_slice %137 {offsets = [0, 64], sizes = [2, 32], strides = [1, 1]} : vector<2x128xf32> to vector<2x32xf32>
    %151 = math.tanh %150 : vector<2x32xf32>
    %152 = vector.extract_strided_slice %137 {offsets = [0, 96], sizes = [2, 32], strides = [1, 1]} : vector<2x128xf32> to vector<2x32xf32>
    %153 = arith.negf %152 : vector<2x32xf32>
    %154 = math.exp %153 : vector<2x32xf32>
    %cst_74 = arith.constant 1.000000e+00 : f32
    %155 = vector.broadcast %cst_74 : f32 to vector<2x32xf32>
    %156 = arith.addf %155, %154 : vector<2x32xf32>
    %157 = arith.divf %155, %156 : vector<2x32xf32>
    %158 = arith.mulf %149, %132 : vector<2x32xf32>
    %159 = arith.mulf %143, %151 : vector<2x32xf32>
    %160 = arith.addf %158, %159 : vector<2x32xf32>
    %161 = math.tanh %160 : vector<2x32xf32>
    %162 = arith.mulf %157, %161 : vector<2x32xf32>
    %c0_75 = arith.constant 0 : index
    %c0_76 = arith.constant 0 : index
    %163 = vector.load %arg5[%c0_75, %c0_76] : memref<2x32xf32, #tpu.memory_space<vmem>>, vector<2x32xf32>
    tpu.vector_store %arg5[%c0_75, %c0_76], %162 {strides = array<i32>} : memref<2x32xf32, #tpu.memory_space<vmem>>, vector<2x32xf32>,
    %c0_77 = arith.constant 0 : index
    %c0_78 = arith.constant 0 : index
    %164 = vector.load %arg6[%c0_77, %c0_78] : memref<2x32xf32, #tpu.memory_space<vmem>>, vector<2x32xf32>
    tpu.vector_store %arg6[%c0_77, %c0_78], %160 {strides = array<i32>} : memref<2x32xf32, #tpu.memory_space<vmem>>, vector<2x32xf32>,
    %c0_79 = arith.constant 0 : index
    %165 = arith.index_cast %130 : i32 to index
    %c0_80 = arith.constant 0 : index
    %c0_81 = arith.constant 0 : index
    %166 = vector.load %arg4[%c0_79, %165, %c0_80, %c0_81] : memref<1x8x2x32xf32, #tpu.memory_space<vmem>>, vector<1x1x2x32xf32>
    %167 = vector.shape_cast %166 : vector<1x1x2x32xf32> to vector<2x32xf32>
    %168 = vector.shape_cast %162 : vector<2x32xf32> to vector<1x1x2x32xf32>
    tpu.vector_store %arg4[%c0_79, %165, %c0_80, %c0_81], %168 {strides = array<i32>} : memref<1x8x2x32xf32, #tpu.memory_space<vmem>>, vector<1x1x2x32xf32>,
    %c4_i32 = arith.constant 4 : i32
    %c0_i32_82 = arith.constant 0 : i32
    %169 = arith.cmpi eq, %arg0, %c0_i32_82 : i32
    %c7_i32_83 = arith.constant 7 : i32
    %170 = arith.subi %c7_i32_83, %c4_i32 : i32
    %171 = arith.select %169, %c4_i32, %170 : i32
    %c0_84 = arith.constant 0 : index
    %c0_85 = arith.constant 0 : index
    %172 = vector.load %arg5[%c0_84, %c0_85] : memref<2x32xf32, #tpu.memory_space<vmem>>, vector<2x32xf32>
    %c0_86 = arith.constant 0 : index
    %c0_87 = arith.constant 0 : index
    %173 = vector.load %arg6[%c0_86, %c0_87] : memref<2x32xf32, #tpu.memory_space<vmem>>, vector<2x32xf32>
    %c0_88 = arith.constant 0 : index
    %174 = arith.index_cast %171 : i32 to index
    %c0_89 = arith.constant 0 : index
    %c0_90 = arith.constant 0 : index
    %175 = vector.load %arg2[%c0_88, %174, %c0_89, %c0_90] : memref<1x8x2x128xf32, #tpu.memory_space<vmem>>, vector<1x1x2x128xf32>
    %176 = vector.shape_cast %175 : vector<1x1x2x128xf32> to vector<2x128xf32>
    %cst_91 = arith.constant dense<0.000000e+00> : vector<2x128xf32>
    %177 = tpu.matmul %172, %4, %cst_91 {dimension_numbers = #tpu.dot_dimension_numbers<[1], [0], [0], [1], [0, 0, 1, 1], [], []>} : vector<2x32xf32>, vector<32x128xf32>, vector<2x128xf32> -> vector<2x128xf32>
    %178 = arith.addf %176, %177 : vector<2x128xf32>
    %179 = vector.extract_strided_slice %178 {offsets = [0, 0], sizes = [2, 32], strides = [1, 1]} : vector<2x128xf32> to vector<2x32xf32>
    %180 = arith.negf %179 : vector<2x32xf32>
    %181 = math.exp %180 : vector<2x32xf32>
    %cst_92 = arith.constant 1.000000e+00 : f32
    %182 = vector.broadcast %cst_92 : f32 to vector<2x32xf32>
    %183 = arith.addf %182, %181 : vector<2x32xf32>
    %184 = arith.divf %182, %183 : vector<2x32xf32>
    %185 = vector.extract_strided_slice %178 {offsets = [0, 32], sizes = [2, 32], strides = [1, 1]} : vector<2x128xf32> to vector<2x32xf32>
    %186 = arith.negf %185 : vector<2x32xf32>
    %187 = math.exp %186 : vector<2x32xf32>
    %cst_93 = arith.constant 1.000000e+00 : f32
    %188 = vector.broadcast %cst_93 : f32 to vector<2x32xf32>
    %189 = arith.addf %188, %187 : vector<2x32xf32>
    %190 = arith.divf %188, %189 : vector<2x32xf32>
    %191 = vector.extract_strided_slice %178 {offsets = [0, 64], sizes = [2, 32], strides = [1, 1]} : vector<2x128xf32> to vector<2x32xf32>
    %192 = math.tanh %191 : vector<2x32xf32>
    %193 = vector.extract_strided_slice %178 {offsets = [0, 96], sizes = [2, 32], strides = [1, 1]} : vector<2x128xf32> to vector<2x32xf32>
    %194 = arith.negf %193 : vector<2x32xf32>
    %195 = math.exp %194 : vector<2x32xf32>
    %cst_94 = arith.constant 1.000000e+00 : f32
    %196 = vector.broadcast %cst_94 : f32 to vector<2x32xf32>
    %197 = arith.addf %196, %195 : vector<2x32xf32>
    %198 = arith.divf %196, %197 : vector<2x32xf32>
    %199 = arith.mulf %190, %173 : vector<2x32xf32>
    %200 = arith.mulf %184, %192 : vector<2x32xf32>
    %201 = arith.addf %199, %200 : vector<2x32xf32>
    %202 = math.tanh %201 : vector<2x32xf32>
    %203 = arith.mulf %198, %202 : vector<2x32xf32>
    %c0_95 = arith.constant 0 : index
    %c0_96 = arith.constant 0 : index
    %204 = vector.load %arg5[%c0_95, %c0_96] : memref<2x32xf32, #tpu.memory_space<vmem>>, vector<2x32xf32>
    tpu.vector_store %arg5[%c0_95, %c0_96], %203 {strides = array<i32>} : memref<2x32xf32, #tpu.memory_space<vmem>>, vector<2x32xf32>,
    %c0_97 = arith.constant 0 : index
    %c0_98 = arith.constant 0 : index
    %205 = vector.load %arg6[%c0_97, %c0_98] : memref<2x32xf32, #tpu.memory_space<vmem>>, vector<2x32xf32>
    tpu.vector_store %arg6[%c0_97, %c0_98], %201 {strides = array<i32>} : memref<2x32xf32, #tpu.memory_space<vmem>>, vector<2x32xf32>,
    %c0_99 = arith.constant 0 : index
    %206 = arith.index_cast %171 : i32 to index
    %c0_100 = arith.constant 0 : index
    %c0_101 = arith.constant 0 : index
    %207 = vector.load %arg4[%c0_99, %206, %c0_100, %c0_101] : memref<1x8x2x32xf32, #tpu.memory_space<vmem>>, vector<1x1x2x32xf32>
    %208 = vector.shape_cast %207 : vector<1x1x2x32xf32> to vector<2x32xf32>
    %209 = vector.shape_cast %203 : vector<2x32xf32> to vector<1x1x2x32xf32>
    tpu.vector_store %arg4[%c0_99, %206, %c0_100, %c0_101], %209 {strides = array<i32>} : memref<1x8x2x32xf32, #tpu.memory_space<vmem>>, vector<1x1x2x32xf32>,
    %c5_i32 = arith.constant 5 : i32
    %c0_i32_102 = arith.constant 0 : i32
    %210 = arith.cmpi eq, %arg0, %c0_i32_102 : i32
    %c7_i32_103 = arith.constant 7 : i32
    %211 = arith.subi %c7_i32_103, %c5_i32 : i32
    %212 = arith.select %210, %c5_i32, %211 : i32
    %c0_104 = arith.constant 0 : index
    %c0_105 = arith.constant 0 : index
    %213 = vector.load %arg5[%c0_104, %c0_105] : memref<2x32xf32, #tpu.memory_space<vmem>>, vector<2x32xf32>
    %c0_106 = arith.constant 0 : index
    %c0_107 = arith.constant 0 : index
    %214 = vector.load %arg6[%c0_106, %c0_107] : memref<2x32xf32, #tpu.memory_space<vmem>>, vector<2x32xf32>
    %c0_108 = arith.constant 0 : index
    %215 = arith.index_cast %212 : i32 to index
    %c0_109 = arith.constant 0 : index
    %c0_110 = arith.constant 0 : index
    %216 = vector.load %arg2[%c0_108, %215, %c0_109, %c0_110] : memref<1x8x2x128xf32, #tpu.memory_space<vmem>>, vector<1x1x2x128xf32>
    %217 = vector.shape_cast %216 : vector<1x1x2x128xf32> to vector<2x128xf32>
    %cst_111 = arith.constant dense<0.000000e+00> : vector<2x128xf32>
    %218 = tpu.matmul %213, %4, %cst_111 {dimension_numbers = #tpu.dot_dimension_numbers<[1], [0], [0], [1], [0, 0, 1, 1], [], []>} : vector<2x32xf32>, vector<32x128xf32>, vector<2x128xf32> -> vector<2x128xf32>
    %219 = arith.addf %217, %218 : vector<2x128xf32>
    %220 = vector.extract_strided_slice %219 {offsets = [0, 0], sizes = [2, 32], strides = [1, 1]} : vector<2x128xf32> to vector<2x32xf32>
    %221 = arith.negf %220 : vector<2x32xf32>
    %222 = math.exp %221 : vector<2x32xf32>
    %cst_112 = arith.constant 1.000000e+00 : f32
    %223 = vector.broadcast %cst_112 : f32 to vector<2x32xf32>
    %224 = arith.addf %223, %222 : vector<2x32xf32>
    %225 = arith.divf %223, %224 : vector<2x32xf32>
    %226 = vector.extract_strided_slice %219 {offsets = [0, 32], sizes = [2, 32], strides = [1, 1]} : vector<2x128xf32> to vector<2x32xf32>
    %227 = arith.negf %226 : vector<2x32xf32>
    %228 = math.exp %227 : vector<2x32xf32>
    %cst_113 = arith.constant 1.000000e+00 : f32
    %229 = vector.broadcast %cst_113 : f32 to vector<2x32xf32>
    %230 = arith.addf %229, %228 : vector<2x32xf32>
    %231 = arith.divf %229, %230 : vector<2x32xf32>
    %232 = vector.extract_strided_slice %219 {offsets = [0, 64], sizes = [2, 32], strides = [1, 1]} : vector<2x128xf32> to vector<2x32xf32>
    %233 = math.tanh %232 : vector<2x32xf32>
    %234 = vector.extract_strided_slice %219 {offsets = [0, 96], sizes = [2, 32], strides = [1, 1]} : vector<2x128xf32> to vector<2x32xf32>
    %235 = arith.negf %234 : vector<2x32xf32>
    %236 = math.exp %235 : vector<2x32xf32>
    %cst_114 = arith.constant 1.000000e+00 : f32
    %237 = vector.broadcast %cst_114 : f32 to vector<2x32xf32>
    %238 = arith.addf %237, %236 : vector<2x32xf32>
    %239 = arith.divf %237, %238 : vector<2x32xf32>
    %240 = arith.mulf %231, %214 : vector<2x32xf32>
    %241 = arith.mulf %225, %233 : vector<2x32xf32>
    %242 = arith.addf %240, %241 : vector<2x32xf32>
    %243 = math.tanh %242 : vector<2x32xf32>
    %244 = arith.mulf %239, %243 : vector<2x32xf32>
    %c0_115 = arith.constant 0 : index
    %c0_116 = arith.constant 0 : index
    %245 = vector.load %arg5[%c0_115, %c0_116] : memref<2x32xf32, #tpu.memory_space<vmem>>, vector<2x32xf32>
    tpu.vector_store %arg5[%c0_115, %c0_116], %244 {strides = array<i32>} : memref<2x32xf32, #tpu.memory_space<vmem>>, vector<2x32xf32>,
    %c0_117 = arith.constant 0 : index
    %c0_118 = arith.constant 0 : index
    %246 = vector.load %arg6[%c0_117, %c0_118] : memref<2x32xf32, #tpu.memory_space<vmem>>, vector<2x32xf32>
    tpu.vector_store %arg6[%c0_117, %c0_118], %242 {strides = array<i32>} : memref<2x32xf32, #tpu.memory_space<vmem>>, vector<2x32xf32>,
    %c0_119 = arith.constant 0 : index
    %247 = arith.index_cast %212 : i32 to index
    %c0_120 = arith.constant 0 : index
    %c0_121 = arith.constant 0 : index
    %248 = vector.load %arg4[%c0_119, %247, %c0_120, %c0_121] : memref<1x8x2x32xf32, #tpu.memory_space<vmem>>, vector<1x1x2x32xf32>
    %249 = vector.shape_cast %248 : vector<1x1x2x32xf32> to vector<2x32xf32>
    %250 = vector.shape_cast %244 : vector<2x32xf32> to vector<1x1x2x32xf32>
    tpu.vector_store %arg4[%c0_119, %247, %c0_120, %c0_121], %250 {strides = array<i32>} : memref<1x8x2x32xf32, #tpu.memory_space<vmem>>, vector<1x1x2x32xf32>,
    %c6_i32 = arith.constant 6 : i32
    %c0_i32_122 = arith.constant 0 : i32
    %251 = arith.cmpi eq, %arg0, %c0_i32_122 : i32
    %c7_i32_123 = arith.constant 7 : i32
    %252 = arith.subi %c7_i32_123, %c6_i32 : i32
    %253 = arith.select %251, %c6_i32, %252 : i32
    %c0_124 = arith.constant 0 : index
    %c0_125 = arith.constant 0 : index
    %254 = vector.load %arg5[%c0_124, %c0_125] : memref<2x32xf32, #tpu.memory_space<vmem>>, vector<2x32xf32>
    %c0_126 = arith.constant 0 : index
    %c0_127 = arith.constant 0 : index
    %255 = vector.load %arg6[%c0_126, %c0_127] : memref<2x32xf32, #tpu.memory_space<vmem>>, vector<2x32xf32>
    %c0_128 = arith.constant 0 : index
    %256 = arith.index_cast %253 : i32 to index
    %c0_129 = arith.constant 0 : index
    %c0_130 = arith.constant 0 : index
    %257 = vector.load %arg2[%c0_128, %256, %c0_129, %c0_130] : memref<1x8x2x128xf32, #tpu.memory_space<vmem>>, vector<1x1x2x128xf32>
    %258 = vector.shape_cast %257 : vector<1x1x2x128xf32> to vector<2x128xf32>
    %cst_131 = arith.constant dense<0.000000e+00> : vector<2x128xf32>
    %259 = tpu.matmul %254, %4, %cst_131 {dimension_numbers = #tpu.dot_dimension_numbers<[1], [0], [0], [1], [0, 0, 1, 1], [], []>} : vector<2x32xf32>, vector<32x128xf32>, vector<2x128xf32> -> vector<2x128xf32>
    %260 = arith.addf %258, %259 : vector<2x128xf32>
    %261 = vector.extract_strided_slice %260 {offsets = [0, 0], sizes = [2, 32], strides = [1, 1]} : vector<2x128xf32> to vector<2x32xf32>
    %262 = arith.negf %261 : vector<2x32xf32>
    %263 = math.exp %262 : vector<2x32xf32>
    %cst_132 = arith.constant 1.000000e+00 : f32
    %264 = vector.broadcast %cst_132 : f32 to vector<2x32xf32>
    %265 = arith.addf %264, %263 : vector<2x32xf32>
    %266 = arith.divf %264, %265 : vector<2x32xf32>
    %267 = vector.extract_strided_slice %260 {offsets = [0, 32], sizes = [2, 32], strides = [1, 1]} : vector<2x128xf32> to vector<2x32xf32>
    %268 = arith.negf %267 : vector<2x32xf32>
    %269 = math.exp %268 : vector<2x32xf32>
    %cst_133 = arith.constant 1.000000e+00 : f32
    %270 = vector.broadcast %cst_133 : f32 to vector<2x32xf32>
    %271 = arith.addf %270, %269 : vector<2x32xf32>
    %272 = arith.divf %270, %271 : vector<2x32xf32>
    %273 = vector.extract_strided_slice %260 {offsets = [0, 64], sizes = [2, 32], strides = [1, 1]} : vector<2x128xf32> to vector<2x32xf32>
    %274 = math.tanh %273 : vector<2x32xf32>
    %275 = vector.extract_strided_slice %260 {offsets = [0, 96], sizes = [2, 32], strides = [1, 1]} : vector<2x128xf32> to vector<2x32xf32>
    %276 = arith.negf %275 : vector<2x32xf32>
    %277 = math.exp %276 : vector<2x32xf32>
    %cst_134 = arith.constant 1.000000e+00 : f32
    %278 = vector.broadcast %cst_134 : f32 to vector<2x32xf32>
    %279 = arith.addf %278, %277 : vector<2x32xf32>
    %280 = arith.divf %278, %279 : vector<2x32xf32>
    %281 = arith.mulf %272, %255 : vector<2x32xf32>
    %282 = arith.mulf %266, %274 : vector<2x32xf32>
    %283 = arith.addf %281, %282 : vector<2x32xf32>
    %284 = math.tanh %283 : vector<2x32xf32>
    %285 = arith.mulf %280, %284 : vector<2x32xf32>
    %c0_135 = arith.constant 0 : index
    %c0_136 = arith.constant 0 : index
    %286 = vector.load %arg5[%c0_135, %c0_136] : memref<2x32xf32, #tpu.memory_space<vmem>>, vector<2x32xf32>
    tpu.vector_store %arg5[%c0_135, %c0_136], %285 {strides = array<i32>} : memref<2x32xf32, #tpu.memory_space<vmem>>, vector<2x32xf32>,
    %c0_137 = arith.constant 0 : index
    %c0_138 = arith.constant 0 : index
    %287 = vector.load %arg6[%c0_137, %c0_138] : memref<2x32xf32, #tpu.memory_space<vmem>>, vector<2x32xf32>
    tpu.vector_store %arg6[%c0_137, %c0_138], %283 {strides = array<i32>} : memref<2x32xf32, #tpu.memory_space<vmem>>, vector<2x32xf32>,
    %c0_139 = arith.constant 0 : index
    %288 = arith.index_cast %253 : i32 to index
    %c0_140 = arith.constant 0 : index
    %c0_141 = arith.constant 0 : index
    %289 = vector.load %arg4[%c0_139, %288, %c0_140, %c0_141] : memref<1x8x2x32xf32, #tpu.memory_space<vmem>>, vector<1x1x2x32xf32>
    %290 = vector.shape_cast %289 : vector<1x1x2x32xf32> to vector<2x32xf32>
    %291 = vector.shape_cast %285 : vector<2x32xf32> to vector<1x1x2x32xf32>
    tpu.vector_store %arg4[%c0_139, %288, %c0_140, %c0_141], %291 {strides = array<i32>} : memref<1x8x2x32xf32, #tpu.memory_space<vmem>>, vector<1x1x2x32xf32>,
    %c7_i32_142 = arith.constant 7 : i32
    %c0_i32_143 = arith.constant 0 : i32
    %292 = arith.cmpi eq, %arg0, %c0_i32_143 : i32
    %c7_i32_144 = arith.constant 7 : i32
    %293 = arith.subi %c7_i32_144, %c7_i32_142 : i32
    %294 = arith.select %292, %c7_i32_142, %293 : i32
    %c0_145 = arith.constant 0 : index
    %c0_146 = arith.constant 0 : index
    %295 = vector.load %arg5[%c0_145, %c0_146] : memref<2x32xf32, #tpu.memory_space<vmem>>, vector<2x32xf32>
    %c0_147 = arith.constant 0 : index
    %c0_148 = arith.constant 0 : index
    %296 = vector.load %arg6[%c0_147, %c0_148] : memref<2x32xf32, #tpu.memory_space<vmem>>, vector<2x32xf32>
    %c0_149 = arith.constant 0 : index
    %297 = arith.index_cast %294 : i32 to index
    %c0_150 = arith.constant 0 : index
    %c0_151 = arith.constant 0 : index
    %298 = vector.load %arg2[%c0_149, %297, %c0_150, %c0_151] : memref<1x8x2x128xf32, #tpu.memory_space<vmem>>, vector<1x1x2x128xf32>
    %299 = vector.shape_cast %298 : vector<1x1x2x128xf32> to vector<2x128xf32>
    %cst_152 = arith.constant dense<0.000000e+00> : vector<2x128xf32>
    %300 = tpu.matmul %295, %4, %cst_152 {dimension_numbers = #tpu.dot_dimension_numbers<[1], [0], [0], [1], [0, 0, 1, 1], [], []>} : vector<2x32xf32>, vector<32x128xf32>, vector<2x128xf32> -> vector<2x128xf32>
    %301 = arith.addf %299, %300 : vector<2x128xf32>
    %302 = vector.extract_strided_slice %301 {offsets = [0, 0], sizes = [2, 32], strides = [1, 1]} : vector<2x128xf32> to vector<2x32xf32>
    %303 = arith.negf %302 : vector<2x32xf32>
    %304 = math.exp %303 : vector<2x32xf32>
    %cst_153 = arith.constant 1.000000e+00 : f32
    %305 = vector.broadcast %cst_153 : f32 to vector<2x32xf32>
    %306 = arith.addf %305, %304 : vector<2x32xf32>
    %307 = arith.divf %305, %306 : vector<2x32xf32>
    %308 = vector.extract_strided_slice %301 {offsets = [0, 32], sizes = [2, 32], strides = [1, 1]} : vector<2x128xf32> to vector<2x32xf32>
    %309 = arith.negf %308 : vector<2x32xf32>
    %310 = math.exp %309 : vector<2x32xf32>
    %cst_154 = arith.constant 1.000000e+00 : f32
    %311 = vector.broadcast %cst_154 : f32 to vector<2x32xf32>
    %312 = arith.addf %311, %310 : vector<2x32xf32>
    %313 = arith.divf %311, %312 : vector<2x32xf32>
    %314 = vector.extract_strided_slice %301 {offsets = [0, 64], sizes = [2, 32], strides = [1, 1]} : vector<2x128xf32> to vector<2x32xf32>
    %315 = math.tanh %314 : vector<2x32xf32>
    %316 = vector.extract_strided_slice %301 {offsets = [0, 96], sizes = [2, 32], strides = [1, 1]} : vector<2x128xf32> to vector<2x32xf32>
    %317 = arith.negf %316 : vector<2x32xf32>
    %318 = math.exp %317 : vector<2x32xf32>
    %cst_155 = arith.constant 1.000000e+00 : f32
    %319 = vector.broadcast %cst_155 : f32 to vector<2x32xf32>
    %320 = arith.addf %319, %318 : vector<2x32xf32>
    %321 = arith.divf %319, %320 : vector<2x32xf32>
    %322 = arith.mulf %313, %296 : vector<2x32xf32>
    %323 = arith.mulf %307, %315 : vector<2x32xf32>
    %324 = arith.addf %322, %323 : vector<2x32xf32>
    %325 = math.tanh %324 : vector<2x32xf32>
    %326 = arith.mulf %321, %325 : vector<2x32xf32>
    %c0_156 = arith.constant 0 : index
    %c0_157 = arith.constant 0 : index
    %327 = vector.load %arg5[%c0_156, %c0_157] : memref<2x32xf32, #tpu.memory_space<vmem>>, vector<2x32xf32>
    tpu.vector_store %arg5[%c0_156, %c0_157], %326 {strides = array<i32>} : memref<2x32xf32, #tpu.memory_space<vmem>>, vector<2x32xf32>,
    %c0_158 = arith.constant 0 : index
    %c0_159 = arith.constant 0 : index
    %328 = vector.load %arg6[%c0_158, %c0_159] : memref<2x32xf32, #tpu.memory_space<vmem>>, vector<2x32xf32>
    tpu.vector_store %arg6[%c0_158, %c0_159], %324 {strides = array<i32>} : memref<2x32xf32, #tpu.memory_space<vmem>>, vector<2x32xf32>,
    %c0_160 = arith.constant 0 : index
    %329 = arith.index_cast %294 : i32 to index
    %c0_161 = arith.constant 0 : index
    %c0_162 = arith.constant 0 : index
    %330 = vector.load %arg4[%c0_160, %329, %c0_161, %c0_162] : memref<1x8x2x32xf32, #tpu.memory_space<vmem>>, vector<1x1x2x32xf32>
    %331 = vector.shape_cast %330 : vector<1x1x2x32xf32> to vector<2x32xf32>
    %332 = vector.shape_cast %326 : vector<2x32xf32> to vector<1x1x2x32xf32>
    tpu.vector_store %arg4[%c0_160, %329, %c0_161, %c0_162], %332 {strides = array<i32>} : memref<1x8x2x32xf32, #tpu.memory_space<vmem>>, vector<1x1x2x32xf32>,
    %c8_i32 = arith.constant 8 : i32
    return
  }
  func.func @transform_0(%arg0: i32, %arg1: i32) -> (i32, i32, i32, i32) {
    %c0_i32 = arith.constant 0 : i32
    %0 = arith.cmpi eq, %arg0, %c0_i32 : i32
    %c0_i32_0 = arith.constant 0 : i32
    %1 = arith.subi %c0_i32_0, %arg1 : i32
    %2 = arith.select %0, %arg1, %1 : i32
    %c0_i32_1 = arith.constant 0 : i32
    %c0_i32_2 = arith.constant 0 : i32
    %c0_i32_3 = arith.constant 0 : i32
    return %arg0, %2, %c0_i32_1, %c0_i32_2 : i32, i32, i32, i32
  }
  func.func @transform_1(%arg0: i32, %arg1: i32) -> (i32, i32, i32) {
    %c0_i32 = arith.constant 0 : i32
    %c0_i32_0 = arith.constant 0 : i32
    %c0_i32_1 = arith.constant 0 : i32
    return %arg0, %c0_i32, %c0_i32_0 : i32, i32, i32
  }
  func.func @transform_2(%arg0: i32, %arg1: i32) -> (i32, i32, i32, i32) {
    %c0_i32 = arith.constant 0 : i32
    %0 = arith.cmpi eq, %arg0, %c0_i32 : i32
    %c0_i32_0 = arith.constant 0 : i32
    %1 = arith.subi %c0_i32_0, %arg1 : i32
    %2 = arith.select %0, %arg1, %1 : i32
    %c0_i32_1 = arith.constant 0 : i32
    %c0_i32_2 = arith.constant 0 : i32
    %c0_i32_3 = arith.constant 0 : i32
    return %arg0, %2, %c0_i32_1, %c0_i32_2 : i32, i32, i32, i32
  }
}

module attributes {stable_mosaic.version = 11 : i64} {
  func.func @ln_fc_kernel(%arg0: i32, %arg1: memref<2x8x2x32xf32, #tpu.memory_space<vmem>>, %arg2: memref<1x64xf32, #tpu.memory_space<vmem>>, %arg3: memref<1x64xf32, #tpu.memory_space<vmem>>, %arg4: memref<64x32xf32, #tpu.memory_space<vmem>>, %arg5: memref<1x32xf32, #tpu.memory_space<vmem>>, %arg6: memref<8x2x32xf32, #tpu.memory_space<vmem>>) attributes {dimension_semantics = [#tpu.dimension_semantics<parallel>], iteration_bounds = array<i64: 1>, scalar_prefetch = 0 : i64, scratch_operands = 0 : i64, tpu.core_type = #tpu.core_type<tc>, window_params = [{transform_indices = @transform_0, window_bounds = array<i64: 2, 8, 2, 32>}, {pipeline_mode = #tpu.pipeline_mode<synchronous>, transform_indices = @transform_1, window_bounds = array<i64: 1, 64>}, {pipeline_mode = #tpu.pipeline_mode<synchronous>, transform_indices = @transform_2, window_bounds = array<i64: 1, 64>}, {pipeline_mode = #tpu.pipeline_mode<synchronous>, transform_indices = @transform_3, window_bounds = array<i64: 64, 32>}, {pipeline_mode = #tpu.pipeline_mode<synchronous>, transform_indices = @transform_4, window_bounds = array<i64: 1, 32>}, {transform_indices = @transform_5, window_bounds = array<i64: 8, 2, 32>}]} {
    %c0 = arith.constant 0 : index
    %c0_0 = arith.constant 0 : index
    %c0_1 = arith.constant 0 : index
    %c0_2 = arith.constant 0 : index
    %0 = vector.load %arg1[%c0, %c0_0, %c0_1, %c0_2] : memref<2x8x2x32xf32, #tpu.memory_space<vmem>>, vector<1x8x2x32xf32>
    %1 = vector.shape_cast %0 : vector<1x8x2x32xf32> to vector<8x2x32xf32>
    %2 = vector.shape_cast %1 : vector<8x2x32xf32> to vector<16x32xf32>
    %c1 = arith.constant 1 : index
    %c0_3 = arith.constant 0 : index
    %c0_4 = arith.constant 0 : index
    %c0_5 = arith.constant 0 : index
    %3 = vector.load %arg1[%c1, %c0_3, %c0_4, %c0_5] : memref<2x8x2x32xf32, #tpu.memory_space<vmem>>, vector<1x8x2x32xf32>
    %4 = vector.shape_cast %3 : vector<1x8x2x32xf32> to vector<8x2x32xf32>
    %5 = vector.shape_cast %4 : vector<8x2x32xf32> to vector<16x32xf32>
    %6 = tpu.concatenate %2, %5 in 1 : vector<16x32xf32>, vector<16x32xf32> -> vector<16x64xf32>
    %cst = arith.constant dense<0.000000e+00> : vector<16xf32>
    %7 = vector.multi_reduction <add>, %6, %cst [1] : vector<16x64xf32> to vector<16xf32>
    %8 = vector.shape_cast %7 : vector<16xf32> to vector<16x1xf32>
    %cst_6 = arith.constant 6.400000e+01 : f32
    %9 = vector.broadcast %cst_6 : f32 to vector<16x1xf32>
    %10 = arith.divf %8, %9 : vector<16x1xf32>
    %11 = vector.broadcast %10 : vector<16x1xf32> to vector<16x64xf32>
    %12 = arith.subf %6, %11 : vector<16x64xf32>
    %13 = arith.mulf %12, %12 : vector<16x64xf32>
    %cst_7 = arith.constant dense<0.000000e+00> : vector<16xf32>
    %14 = vector.multi_reduction <add>, %13, %cst_7 [1] : vector<16x64xf32> to vector<16xf32>
    %15 = vector.shape_cast %14 : vector<16xf32> to vector<16x1xf32>
    %cst_8 = arith.constant 6.400000e+01 : f32
    %16 = vector.broadcast %cst_8 : f32 to vector<16x1xf32>
    %17 = arith.divf %15, %16 : vector<16x1xf32>
    %18 = vector.broadcast %10 : vector<16x1xf32> to vector<16x64xf32>
    %19 = arith.subf %6, %18 : vector<16x64xf32>
    %cst_9 = arith.constant 9.99999974E-6 : f32
    %20 = vector.broadcast %cst_9 : f32 to vector<16x1xf32>
    %21 = arith.addf %17, %20 : vector<16x1xf32>
    %22 = math.rsqrt %21 : vector<16x1xf32>
    %23 = vector.broadcast %22 : vector<16x1xf32> to vector<16x64xf32>
    %24 = arith.mulf %19, %23 : vector<16x64xf32>
    %c0_10 = arith.constant 0 : index
    %c0_11 = arith.constant 0 : index
    %25 = vector.load %arg2[%c0_10, %c0_11] : memref<1x64xf32, #tpu.memory_space<vmem>>, vector<1x64xf32>
    %26 = vector.broadcast %25 : vector<1x64xf32> to vector<16x64xf32>
    %27 = arith.mulf %24, %26 : vector<16x64xf32>
    %c0_12 = arith.constant 0 : index
    %c0_13 = arith.constant 0 : index
    %28 = vector.load %arg3[%c0_12, %c0_13] : memref<1x64xf32, #tpu.memory_space<vmem>>, vector<1x64xf32>
    %29 = vector.broadcast %28 : vector<1x64xf32> to vector<16x64xf32>
    %30 = arith.addf %27, %29 : vector<16x64xf32>
    %c0_14 = arith.constant 0 : index
    %c0_15 = arith.constant 0 : index
    %31 = vector.load %arg4[%c0_14, %c0_15] : memref<64x32xf32, #tpu.memory_space<vmem>>, vector<64x32xf32>
    %cst_16 = arith.constant dense<0.000000e+00> : vector<16x32xf32>
    %32 = tpu.matmul %30, %31, %cst_16 {dimension_numbers = #tpu.dot_dimension_numbers<[1], [0], [0], [1], [0, 0, 1, 1], [], []>} : vector<16x64xf32>, vector<64x32xf32>, vector<16x32xf32> -> vector<16x32xf32>
    %c0_17 = arith.constant 0 : index
    %c0_18 = arith.constant 0 : index
    %33 = vector.load %arg5[%c0_17, %c0_18] : memref<1x32xf32, #tpu.memory_space<vmem>>, vector<1x32xf32>
    %34 = vector.broadcast %33 : vector<1x32xf32> to vector<16x32xf32>
    %35 = arith.addf %32, %34 : vector<16x32xf32>
    %36 = vector.shape_cast %35 : vector<16x32xf32> to vector<8x2x32xf32>
    %c0_19 = arith.constant 0 : index
    %c0_20 = arith.constant 0 : index
    %c0_21 = arith.constant 0 : index
    %37 = vector.load %arg6[%c0_19, %c0_20, %c0_21] : memref<8x2x32xf32, #tpu.memory_space<vmem>>, vector<8x2x32xf32>
    tpu.vector_store %arg6[%c0_19, %c0_20, %c0_21], %36 {strides = array<i32>} : memref<8x2x32xf32, #tpu.memory_space<vmem>>, vector<8x2x32xf32>,
    return
  }
  func.func @transform_0(%arg0: i32) -> (i32, i32, i32, i32) {
    %c0_i32 = arith.constant 0 : i32
    %c0_i32_0 = arith.constant 0 : i32
    %c0_i32_1 = arith.constant 0 : i32
    %c0_i32_2 = arith.constant 0 : i32
    return %c0_i32, %arg0, %c0_i32_0, %c0_i32_1 : i32, i32, i32, i32
  }
  func.func @transform_1(%arg0: i32) -> (i32, i32) {
    %c0_i32 = arith.constant 0 : i32
    %c0_i32_0 = arith.constant 0 : i32
    %c0_i32_1 = arith.constant 0 : i32
    return %c0_i32, %c0_i32_0 : i32, i32
  }
  func.func @transform_2(%arg0: i32) -> (i32, i32) {
    %c0_i32 = arith.constant 0 : i32
    %c0_i32_0 = arith.constant 0 : i32
    %c0_i32_1 = arith.constant 0 : i32
    return %c0_i32, %c0_i32_0 : i32, i32
  }
  func.func @transform_3(%arg0: i32) -> (i32, i32) {
    %c0_i32 = arith.constant 0 : i32
    %c0_i32_0 = arith.constant 0 : i32
    %c0_i32_1 = arith.constant 0 : i32
    return %c0_i32, %c0_i32_0 : i32, i32
  }
  func.func @transform_4(%arg0: i32) -> (i32, i32) {
    %c0_i32 = arith.constant 0 : i32
    %c0_i32_0 = arith.constant 0 : i32
    %c0_i32_1 = arith.constant 0 : i32
    return %c0_i32, %c0_i32_0 : i32, i32
  }
  func.func @transform_5(%arg0: i32) -> (i32, i32, i32) {
    %c0_i32 = arith.constant 0 : i32
    %c0_i32_0 = arith.constant 0 : i32
    %c0_i32_1 = arith.constant 0 : i32
    return %arg0, %c0_i32, %c0_i32_0 : i32, i32, i32
  }
}

</mosaic_0001>

<bundles_post_ra>
// kernel: lstm_cell_forward.3
= control target key start
LH: loop header
LB: loop body
LE: loop exit
PB: predicated region body
PF: predicated region fallthrough
CT: control target
= control target key end

     0   :  { %8 = vsyncpa [#allocation3], 0  ;;  %s885_s0 = inlined_call_operand.vmem [shape: f32[8,2,16], index: 0, kind: input, shape index: {}]   ;;  %s886_s1 = inlined_call_operand.vmem [shape: f32[2,16,128], index: 1, kind: input, shape index: {}]   ;;  %s887_s2 = inlined_call_operand.hbm [shape: f32[2,1,128], index: 2, kind: input, shape index: {}]   ;;  %s888_s3 = inlined_call_operand.vmem [shape: f32[2,8,2,128], index: 3, kind: output, shape index: {}]  }
   0x1   :  { %10 = vsyncpa [#allocation3 + $0x1], 0  ;;  %s748_s12 = smov 0   ;;  %s750_s13 = smov 0  }
   0x2   :  { %s752_s14 = smov 0   ;;  %s754_s15 = smov 0  }
   0x3   :  { %s756_s16 = smov 0   ;;  %s758_s17 = smov 0  }
   0x4 LB: > { %s557_s18 = sadd.s32 4294967295, %s724_s17   ;;  %s28_s19 = sadd.s32 1, %s720_s16  ;;  %s724_s17 = sphi %s758_s17, %s16_s17   ;;  %s720_s16 = sphi %s756_s16, %s896_s16   ;;  %s716_s15 = sphi %s754_s15, %s895_s15   ;;  %s712_s14 = sphi %s752_s14, %s894_s14   ;;  %s708_s13 = sphi %s750_s13, %s893_s13   ;;  %s704_s12 = sphi %s748_s12, %s892_s12  }
   0x5   : > { %p30_p0 = scmp.ge.s32.totalorder %s28_s19, 2  ;;  %s87_s20 = sadd.s32 1, %s712_s14 }
   0x6   : > { %p94_p1 = scmp.ne.s32.totalorder %s712_s14, %s708_s13  ;;  %p95_p2 = scmp.eq.s32.totalorder %s724_s17, 0 }
   0x7   : > { %s898_s19 = smov (%p30_p0, %s28_s19), 0  ;;  %p100_p4 = scmp.ne.s32.totalorder %s708_s13, %s704_s12 }
   0x8   : > { %p784_p3 = por %p95_p2, %p94_p1  ;;  %s84_s22 = ssub.s32 %s720_s16, %s898_s19 }
   0x9   : > { %p101_p5 = scmp.eq.s32.totalorder %s557_s18, 0  ;;  %p85_p6 = scmp.eq.s32.totalorder %s84_s22, 0 }
   0xa   : > { %p596_p8 = scmp.lt.s32.totalorder %s724_s17, 2  ;;  %s169_s25 = sand.u32 1, %s712_s14  }
   0xb   : > { %p791_p7 = por %p101_p5, %p100_p4  ;;  %s562_s26 = sshll.u32 %s720_s16, 4 }
   0xc   : > { %s797_s24 = scalar_select %p85_p6, %s712_s14, %s87_s20  }
   0xd   : > { %s177_s29 = scalar_lea.hbm %s887_s2, %s562_s26  ;;  %s172_s30 = scalar_lea.vmem [#allocation2], %s169_s25 }
   0xe   : > { %s179_s4 = sshll.u32 %s172_s30, 4  ;;  %p806_p9 = pnand %p596_p8, %p784_p3  ;;  %s180_s4 = int_to_ptr.vmem [resolvable:$true] %s179_s4 }
   0xf   : > { %p563_p10 = scmp.ge.s32.totalorder %s724_s17, 1  ;;  %p184_p11 = scmp.lt.s32.totalorder %s724_s17, 3 }
  0x10   : > { %s170_s6 = scalar_lea.sflag [#allocation3], %s169_s25  ;;  %p648_p12 = pneg %p806_p9 }
  0x11   : > { %s659_s7 = scalar_lea.vmem %s180_s4, 16  ;;  %s726_s8 = smov [#allocation2]  }
  0x12   : > { %p660_p13 = scmp.ne.s32.totalorder %s180_s4, %s659_s7  ;;  %s664_s9 = sshll.u32 %s726_s8, 4  ;;  %s665_s9 = int_to_ptr.vmem [resolvable:$false] %s664_s9 }
  0x13   : > { %s666_s10 = scalar_lea.vmem %s665_s9, 32  ;;  %p667_p2 = scmp.lt.s32.totalorder %s180_s4, %s665_s9 }
  0x14   : > { %p662_p0 = pnand %p660_p13, %p648_p12  ;;  %p668_p4 = scmp.lt.s32.totalorder %s666_s10, %s659_s7 }
  0x16   : > { %p663_p1 = pneg %p662_p0  ;;  %p669_p3 = por %p668_p4, %p667_p2 }
  0x18   : > { %p670_p5 = pnand %p669_p3, %p663_p1 }
  0x1a   : > { %673 = shalt.err (!%p670_p5)
}
  0x1b   : > { %595 = dma.hbm_to_vmem [thread:$0]  (!%p806_p9), %s177_s29, 16, %s180_s4, %s170_s6  }
  0x1c   : > { %p185_p6 = pnand %p563_p10, %p184_p11 }
  0x1d   : > { %s190_s11 = sand.u32 (!%p185_p6), 1, %s708_s13  }
  0x1e   : > { %188 = sbr.rel (%p185_p6) target bundleno = 252 (0xfc), region = 32  ;;  %s191_s12 = scalar_lea.sflag (!%p185_p6), [#allocation3], %s190_s11 }
  0x1f   : > { %s821_s18 = scalar_lea.vmem (!%p185_p6), [#allocation2], %s190_s11 }
  0x23   : > { %699 = dma.done.wait (%p791_p7), %s191_s12, 16  }
  0x24   : > { %701 = vsyncadd (%p791_p7), %s191_s12, 4294967280  ;;  %p235_p8 = scmp.lt.s32.totalorder %s716_s15, 1  ;;  %v280_v0 = vlaneseq  ;;  %v727_v1 = vmov 1983009808   ;;  %v250_v7 = vld [vmem:[%s885_s0] sm:$0x3] }
  0x25   : > { %v278_v2 = vunpack.c.l.s4 %v727_v1  ;;  %v251_v9 = vld [vmem:[%s885_s0 + $0x2] sm:$0x3]  ;;  %v252_v10 = vld [vmem:[%s885_s0 + $0x4] sm:$0x3]  ;;  %v253_v11 = vld [vmem:[%s885_s0 + $0x6] sm:$0x3] }
  0x26   : > { %s900_s15 = smov (!%p235_p8, %s716_s15), 1  ;;  %v281_v4 = vshrl.u32 %v280_v0, 7  ;;  %v275_v12 = vcombine.low %v250_v7, %v251_v9  ;;  %v276_v13 = vcombine.low %v252_v10, %v253_v11  ;;  %v254_v14 = vld [vmem:[%s885_s0 + $0x8] sm:$0x3]  ;;  %v255_v15 = vld [vmem:[%s885_s0 + $0xa] sm:$0x3] }
  0x27   : > { %v279_v3 = vunpack.c.0.s8 %v278_v2  ;;  %s577_s20 = sshll.u32 %s900_s15, 4  ;;  %v256_v16 = vld [vmem:[%s885_s0 + $0xc] sm:$0x3]  ;;  %v257_v17 = vld [vmem:[%s885_s0 + $0xe] sm:$0x3]  ;;  %v292_v18 = vcombine.low %v254_v14, %v255_v15  ;;  %vm309_vm0 = vcmask 130048  }
  0x28   : > { %s239_s25 = scalar_lea.vmem %s886_s1, %s577_s20  ;;  %v293_v21 = vcombine.low %v256_v16, %v257_v17  ;;  %v568_v26 = vld [vmem:[%s821_s18] ss:$0 sm:$0xff]  ;;  %s248_s23 = scalar_lea.vmem %s888_s3, %s577_s20 }
  0x29   : > { %v259_v5 = vld [vmem:[%s239_s25 + $0x8] sm:$0xff]  ;;  %v258_v6 = vld [vmem:[%s239_s25] sm:$0xff]  ;;  %v282_v8 = vsub.s32 %v279_v3, %v281_v4 }
  0x2a   : > { %583 = vmatprep.subr.mxu0 %v259_v5 }
  0x2b   : > { %584 = vmatpush3.msra.mxu0 %v259_v5  ;;  %v283_v19 = vrot.slane %v275_v12, %v282_v8  ;;  %v290_v20 = vrot.slane %v276_v13, %v282_v8  ;;  %v300_v22 = vrot.slane %v292_v18, %v282_v8  ;;  %v307_v24 = vrot.slane %v293_v21, %v282_v8 }
  0x2c   : > { %585 = vmatprep.subr.mxu0 %v258_v6 }
  0x2d   : > { %586 = vmatpush3.msra.mxu0 %v258_v6  ;;  %v291_v23 = vcombine.low %v283_v19, %v290_v20  ;;  %v308_v25 = vcombine.low %v300_v22, %v307_v24 }
  0x2f   : > { %587 = vmatprep.mubr.msk.f32.mxu0 %vm309_vm0, %v291_v23 }
  0x30   : > { %588 = vmatmul.mubr.msk.f32.vlgmr.msra.gmra.mxu0 %vm309_vm0, %v308_v25 }
  0xf0   : > { %v589_v27 = vpop.f32.mrf.mxu0 }
  0xf1   : > { %v386_v28 = vadd.f32 %v589_v27, %v568_v26 }
  0xf2   : > { %v380_v29 = vpop.f32.mrf.mxu0 }
  0xf3   : > { %v408_v30 = vcombine.high %v386_v28, %v386_v28  ;;  %v415_v31 = vrot.slane %v386_v28, %v282_v8  ;;  %573 = vst.sshfl [vmem:[%s248_s23 + $0x8] sm:$0x3 pattern:$0x76325410] %v386_v28  ;;  %v381_v32 = vadd.f32 %v568_v26, %v380_v29 }
  0xf5   : > { %v422_v33 = vrot.slane %v408_v30, %v282_v8  ;;  %v423_v34 = vcombine.high %v415_v31, %v415_v31  ;;  %574 = vst.sshfl [vmem:[%s248_s23 + $0xc] sm:$0x3 pattern:$0x76325410] %v408_v30  ;;  %v391_v35 = vcombine.high %v381_v32, %v381_v32  ;;  %v398_v36 = vrot.slane %v381_v32, %v282_v8 }
  0xf6   : > { %571 = vst.sshfl [vmem:[%s248_s23] sm:$0x3 pattern:$0x76325410] %v381_v32 }
  0xf7   : > { %v424_v37 = vcombine.high %v422_v33, %v422_v33  ;;  %438 = vst [vmem:[%s248_s23 + $0xa] sm:$0x3] %v423_v34  ;;  %v405_v38 = vrot.slane %v391_v35, %v282_v8  ;;  %v406_v39 = vcombine.high %v398_v36, %v398_v36  ;;  %572 = vst.sshfl [vmem:[%s248_s23 + $0x4] sm:$0x3 pattern:$0x76325410] %v391_v35 }
  0xf9   : > { %440 = vst [vmem:[%s248_s23 + $0xe] sm:$0x3] %v424_v37  ;;  %v407_v40 = vcombine.high %v405_v38, %v405_v38  ;;  %434 = vst [vmem:[%s248_s23 + $0x2] sm:$0x3] %v406_v39 }
  0xfb   : > { %436 = vst [vmem:[%s248_s23 + $0x6] sm:$0x3] %v407_v40 }
  0xfc PF: > { %s16_s17 = sadd.s32 1, %s724_s17   ;;  %s892_s12 = smov %s708_s13 }
  0xfd   : > { %p13_p7 = scmp.ge.s32.totalorder %s16_s17, 4   ;;  %s893_s13 = smov %s712_s14 }
  0xfe   : > { %s894_s14 = smov %s797_s24  ;;  %s895_s15 = smov %s720_s16 }
  0xff   : > { %s896_s16 = smov %s898_s19  ;;  %15 = sbr.rel (!%p13_p7) target bundleno = 4 (0x4), region = 78 }
 0x104   :  { %471 = vsyncpa [#allocation3], 1 }
 0x105   :  { %473 = vsyncpa [#allocation3 + $0x1], 1 }

// kernel: lstm_cell_forward.5
= control target key start
LH: loop header
LB: loop body
LE: loop exit
PB: predicated region body
PF: predicated region fallthrough
CT: control target
= control target key end

     0   :  { %v50_v0 = vlaneseq  ;;  %v379_v4 = vmov 1983009808   ;;  %s380_s9 = smov 32   ;;  %vm129_vm0 = vcmask 261120   ;;  %vm132_vm1 = vcmask 523264   ;;  %s544_s0 = inlined_call_operand.vmem [shape: f32[2,8,2,32], index: 0, kind: input, shape index: {}]   ;;  %s545_s3 = inlined_call_operand.vmem [shape: f32[64,32], index: 3, kind: input, shape index: {}]   ;;  %s546_s1 = inlined_call_operand.vmem [shape: f32[1,64], index: 1, kind: input, shape index: {}]   ;;  %s547_s2 = inlined_call_operand.vmem [shape: f32[1,64], index: 2, kind: input, shape index: {}]   ;;  %s548_s4 = inlined_call_operand.vmem [shape: f32[1,32], index: 4, kind: input, shape index: {}]   ;;  %s549_s5 = inlined_call_operand.vmem [shape: f32[8,2,32], index: 5, kind: output, shape index: {}]  }
   0x1   :  { %v331_v1 = vld [vmem:[%s544_s0 + $0x10] sm:$0x3]  ;;  %v332_v2 = vld [vmem:[%s544_s0 + $0x12] sm:$0x3]  ;;  %v333_v3 = vld [vmem:[%s544_s0 + $0x14] sm:$0x3]  ;;  %v48_v5 = vunpack.c.l.s4 %v379_v4 }
   0x2   :  { %v334_v6 = vld [vmem:[%s544_s0 + $0x16] sm:$0x3]  ;;  %v51_v7 = vshrl.u32 %v50_v0, 7  ;;  %v335_v8 = vld [vmem:[%s544_s0 + $0x18] sm:$0x3]  ;;  %v89_v10 = vcombine.low %v331_v1, %v332_v2  ;;  %v183_v60 = vld [vmem:[%s545_s3 + $0x28] sm:$0xff] }
   0x3   :  { %v49_v9 = vunpack.c.0.s8 %v48_v5  ;;  %v90_v11 = vcombine.low %v333_v3, %v334_v6  ;;  %v336_v12 = vld [vmem:[%s544_s0 + $0x1a] sm:$0x3]  ;;  %v337_v13 = vld [vmem:[%s544_s0 + $0x1c] sm:$0x3]  ;;  %v338_v14 = vld [vmem:[%s544_s0 + $0x1e] sm:$0x3] }
   0x4   :  { %v106_v15 = vcombine.low %v335_v8, %v336_v12  ;;  %v107_v16 = vcombine.low %v337_v13, %v338_v14  ;;  %v20_v24 = vld [vmem:[%s544_s0] sm:$0x3]  ;;  %v21_v25 = vld [vmem:[%s544_s0 + $0x2] sm:$0x3]  ;;  %v22_v26 = vld [vmem:[%s544_s0 + $0x4] sm:$0x3] }
   0x5   :  { %v435_v17 = vsub.s32 %v49_v9, %v51_v7  ;;  %v23_v27 = vld [vmem:[%s544_s0 + $0x6] sm:$0x3]  ;;  %v45_v28 = vcombine.low %v20_v24, %v21_v25  ;;  %v24_v30 = vld [vmem:[%s544_s0 + $0x8] sm:$0x3]  ;;  %v25_v31 = vld [vmem:[%s544_s0 + $0xa] sm:$0x3] }
   0x6   :  { %v46_v29 = vcombine.low %v22_v26, %v23_v27  ;;  %v26_v32 = vld [vmem:[%s544_s0 + $0xc] sm:$0x3]  ;;  %v27_v33 = vld [vmem:[%s544_s0 + $0xe] sm:$0x3]  ;;  %v62_v36 = vcombine.low %v24_v30, %v25_v31  ;;  %v185_v58 = vld [vmem:[%s545_s3 + $0x38] sm:$0xff]  ;;  %vm318_vm2 = vcmask 254976  }
   0x7   :  { %v97_v18 = vrot.slane %v89_v10, %v435_v17  ;;  %v104_v19 = vrot.slane %v90_v11, %v435_v17  ;;  %v114_v20 = vrot.slane %v106_v15, %v435_v17  ;;  %v121_v21 = vrot.slane %v107_v16, %v435_v17  ;;  %v184_v59 = vld [vmem:[%s545_s3 + $0x30] sm:$0xff]  ;;  %354 = vmatprep.subr.mxu0 %v185_v58  ;;  %v182_v61 = vld [vmem:[%s545_s3 + $0x20] sm:$0xff]  ;;  %v181_v62 = vld [vmem:[%s545_s3 + $0x18] sm:$0xff] }
   0x8   :  { %v53_v34 = vrot.slane %v45_v28, %v435_v17  ;;  %v60_v35 = vrot.slane %v46_v29, %v435_v17  ;;  %v63_v37 = vcombine.low %v26_v32, %v27_v33  ;;  %v70_v39 = vrot.slane %v62_v36, %v435_v17  ;;  %355 = vmatpush3.msra.mxu0 %v185_v58  ;;  %v180_v63 = vld [vmem:[%s545_s3 + $0x10] sm:$0xff]  ;;  %v179_v0 = vld [vmem:[%s545_s3 + $0x8] sm:$0xff]  ;;  %v178_v1 = vld [vmem:[%s545_s3] sm:$0xff] }
   0x9   :  { %v105_v22 = vcombine.low %v97_v18, %v104_v19  ;;  %v122_v23 = vcombine.low %v114_v20, %v121_v21  ;;  %356 = vmatprep.subr.mxu0 %v184_v59  ;;  %v339_v9 = vld [vmem:[%s546_s1] ss:$0 sm:$0xff] }
   0xa   :  { %v61_v38 = vcombine.low %v53_v34, %v60_v35  ;;  %v77_v40 = vrot.slane %v63_v37, %v435_v17  ;;  %357 = vmatpush3.msra.mxu0 %v184_v59  ;;  %v340_v11 = vld [vmem:[%s547_s2] ss:$0 sm:$0xff] }
   0xb   :  { %123 = vrot.lane.b32.xlu0 %v105_v22, %s380_s9  ;;  %358 = vmatprep.subr.mxu0 %v183_v60  ;;  %v341_v19 = vld [vmem:[%s548_s4] ss:$0 sm:$0xff] }
   0xc   :  { %v78_v43 = vcombine.low %v70_v39, %v77_v40  ;;  %359 = vmatpush3.msra.mxu0 %v183_v60 }
   0xd   :  { %360 = vmatprep.subr.mxu0 %v182_v61 }
   0xe   :  { %361 = vmatpush3.msra.mxu0 %v182_v61 }
   0xf   :  { %125 = vrot.lane.b32.xlu0 %v122_v23, %s380_s9  ;;  %362 = vmatprep.subr.mxu0 %v181_v62 }
  0x10   :  { %363 = vmatpush3.msra.mxu0 %v181_v62 }
  0x11   :  { %364 = vmatprep.subr.mxu0 %v180_v63 }
  0x12   :  { %365 = vmatpush3.msra.mxu0 %v180_v63 }
  0x13   :  { %366 = vmatprep.subr.mxu0 %v179_v0 }
  0x14   :  { %367 = vmatpush3.msra.mxu0 %v179_v0 }
  0x15   :  { %368 = vmatprep.subr.mxu0 %v178_v1 }
  0x16   :  { %369 = vmatpush3.msra.mxu0 %v178_v1 }
  0x7d   :  { %v124_v41 = vpop.permute.xlu0 %123 }
  0x7e   :  { %v130_v42 = vsel %vm129_vm0, %v61_v38, %v124_v41 }
  0x7f   :  { %v133_v44 = vsel %vm132_vm1, %v130_v42, 0.0 }
  0x80   :  { %134 = vadd.xlane.f32.xlu1 %v133_v44 }
  0x81   :  { %v126_v45 = vpop.permute.xlu0 %125 }
  0x82   :  { %v131_v46 = vsel %vm129_vm0, %v78_v43, %v126_v45 }
  0x83   :  { %v136_v47 = vsel %vm132_vm1, %v131_v46, 0.0 }
  0x84   :  { %137 = vadd.xlane.f32.xlu1 %v136_v47 }
 0x109   :  { %v135_v48 = vpop.xlane.xlu1 %134 }
 0x10a   :  { %v140_v49 = vmul.f32 0.015625, %v135_v48 }
 0x10c   :  { %v142_v50 = vsub.f32 %v130_v42, %v140_v49 }
 0x10d   :  { %v138_v51 = vpop.xlane.xlu1 %137 }
 0x10e   :  { %v141_v52 = vmul.f32 0.015625, %v138_v51  ;;  %v144_v53 = vmul.f32 %v142_v50, %v142_v50 }
 0x110   :  { %v143_v54 = vsub.f32 %v131_v46, %v141_v52  ;;  %v146_v55 = vsel %vm132_vm1, %v144_v53, 0.0 }
 0x111   :  { %147 = vadd.xlane.f32.xlu0 %v146_v55 }
 0x112   :  { %v145_v56 = vmul.f32 %v143_v54, %v143_v54 }
 0x114   :  { %v149_v57 = vsel %vm132_vm1, %v145_v56, 0.0 }
 0x115   :  { %150 = vadd.xlane.f32.xlu1 %v149_v57 }
 0x19a   :  { %v148_v2 = vpop.xlane.xlu0 %147 }
 0x19b   :  { %v152_v3 = vmul.f32 0.015625, %v148_v2 }
 0x19d   :  { %v154_v4 = vadd.f32 1e-05, %v152_v3 }
 0x19e   :  { %v151_v5 = vpop.xlane.xlu1 %150 }
 0x19f   :  { %375 = vrsqrt.f32 %v154_v4  ;;  %v153_v6 = vmul.f32 0.015625, %v151_v5 }
 0x1a1   :  { %v155_v7 = vadd.f32 1e-05, %v153_v6 }
 0x1a3   :  { %377 = vrsqrt.f32 %v155_v7 }
 0x1ac   :  { %v376_v8 = vpop.eup %375 }
 0x1ad   :  { %v158_v10 = vmul.f32 %v376_v8, %v142_v50 }
 0x1af   :  { %v167_v12 = vmul.f32 %v339_v9, %v158_v10 }
 0x1b0   :  { %v378_v13 = vpop.eup %377 }
 0x1b1   :  { %v159_v14 = vmul.f32 %v378_v13, %v143_v54  ;;  %v176_v15 = vadd.f32 %v340_v11, %v167_v12 }
 0x1b3   :  { %v168_v16 = vmul.f32 %v339_v9, %v159_v14  ;;  %370 = vmatprep.mubr.msk.f32.mxu0 %vm132_vm1, %v176_v15 }
 0x1b5   :  { %v177_v18 = vadd.f32 %v340_v11, %v168_v16 }
 0x1b7   :  { %371 = vmatmul.mubr.msk.f32.vlgmr.msra.gmra.mxu0 %vm132_vm1, %v177_v18 }
 0x277   :  { %v372_v20 = vpop.f32.mrf.mxu0 }
 0x278   :  { %v271_v21 = vadd.f32 %v372_v20, %v341_v19 }
 0x279   :  { %v265_v22 = vpop.f32.mrf.mxu0 }
 0x27a   :  { %v293_v23 = vcombine.high %v271_v21, %v271_v21  ;;  %v300_v24 = vrot.slane %v271_v21, %v435_v17  ;;  %v266_v25 = vadd.f32 %v341_v19, %v265_v22 }
 0x27c   :  { %v307_v26 = vrot.slane %v293_v23, %v435_v17  ;;  %v308_v27 = vcombine.high %v300_v24, %v300_v24  ;;  %323 = vst.msk [vmem:[%s549_s5 + $0x8] sm:$0x3] %vm318_vm2, %v300_v24  ;;  %v276_v28 = vcombine.high %v266_v25, %v266_v25  ;;  %v283_v29 = vrot.slane %v266_v25, %v435_v17 }
 0x27e   :  { %v309_v30 = vcombine.high %v307_v26, %v307_v26  ;;  %324 = vst.msk [vmem:[%s549_s5 + $0xa] sm:$0x3] %vm318_vm2, %v308_v27  ;;  %325 = vst.msk [vmem:[%s549_s5 + $0xc] sm:$0x3] %vm318_vm2, %v307_v26  ;;  %v290_v31 = vrot.slane %v276_v28, %v435_v17  ;;  %v291_v32 = vcombine.high %v283_v29, %v283_v29 }
 0x27f   :  { %319 = vst.msk [vmem:[%s549_s5] sm:$0x3] %vm318_vm2, %v283_v29 }
 0x280   :  { %326 = vst.msk [vmem:[%s549_s5 + $0xe] sm:$0x3] %vm318_vm2, %v309_v30  ;;  %v292_v33 = vcombine.high %v290_v31, %v290_v31  ;;  %320 = vst.msk [vmem:[%s549_s5 + $0x2] sm:$0x3] %vm318_vm2, %v291_v32 }
 0x281   :  { %321 = vst.msk [vmem:[%s549_s5 + $0x4] sm:$0x3] %vm318_vm2, %v290_v31 }
 0x282   :  { %322 = vst.msk [vmem:[%s549_s5 + $0x6] sm:$0x3] %vm318_vm2, %v292_v33 }

// kernel: lstm_cell_forward.4
= control target key start
LH: loop header
LB: loop body
LE: loop exit
PB: predicated region body
PF: predicated region fallthrough
CT: control target
= control target key end

     0   :  { %s1658_s9 = smov 0   ;;  %s1660_s10 = smov 0   ;;  %s1971_s0 = inlined_call_operand.vmem [shape: f32[2,8,2,128], index: 0, kind: input, shape index: {}]   ;;  %s1972_s1 = inlined_call_operand.vmem [shape: f32[2,32,128], index: 1, kind: input, shape index: {}]   ;;  %s1973_s2 = inlined_call_operand.vmem [shape: f32[2,8,2,32], index: 2, kind: output, shape index: {}]  }
   0x1   :  { %s1662_s11 = smov 0  }
   0x2 LB: > { %s24_s12 = sadd.s32 1, %s1632_s10  ;;  %p1357_p0 = scmp.ge.s32.totalorder %s1636_s11, 1  ;;  %s1636_s11 = sphi %s1662_s11, %s12_s11   ;;  %s1632_s10 = sphi %s1660_s10, %s1975_s10   ;;  %s1628_s9 = sphi %s1658_s9, %s1974_s9  }
   0x3   : > { %p26_p1 = scmp.ge.s32.totalorder %s24_s12, 2  ;;  %p161_p2 = scmp.lt.s32.totalorder %s1636_s11, 3 }
   0x5   : > { %s1977_s12 = smov (%p26_p1, %s24_s12), 0  ;;  %p162_p3 = pnand %p1357_p0, %p161_p2 }
   0x6   : > { %p206_p4 = scmp.lt.s32.totalorder (!%p162_p3), %s1628_s9, 1  ;;  %p250_p5 = scmp.eq.s32.totalorder (!%p162_p3), %s1628_s9, 0 }
   0x7   : > { %165 = sbr.rel (%p162_p3) target bundleno = 5593 (0x15d9), region = 28  ;;  %s1640_s25 = smov (!%p162_p3), 64  }
   0x8   : > { %s1641_s26 = smov (!%p162_p3), 32   ;;  %s1642_s27 = smov (!%p162_p3), 96  }
   0xc   : > { %vm243_vm0 = vcmask 254976   ;;  %v1638_v0 = vmov 0.0   ;;  %vm1639_vm1 = vmmov 0   ;;  %s1687_s13 = scalar_select %p206_p4, %s1628_s9, 1  ;;  %vm257_vm2 = vcmask 261120  }
   0xd   : > { %1433 = vmatprep.subr.mxu0 %v1638_v0  ;;  %1441 = vmatprep.mubr.msk.f32.mxu0 %vm1639_vm1, %v1638_v0  ;;  %244 = vst.msk [vmem:[#allocation2] sm:$0x3] %vm243_vm0, %v1638_v0  ;;  %245 = vst.msk [vmem:[#allocation3] sm:$0x3] %vm243_vm0, %v1638_v0  ;;  %s1734_s18 = scalar_select %p250_p5, 0, 7 }
   0xe   : > { %1444 = vmatprep.subr.mxu1 %v1638_v0  ;;  %1452 = vmatprep.mubr.msk.f32.mxu1 %vm1639_vm1, %v1638_v0  ;;  %s1391_s14 = sshll.u32 %s1687_s13, 5  ;;  %s1390_s19 = sshll.u32 %s1687_s13, 4 }
   0xf   : > { %s222_s17 = scalar_lea.vmem %s1972_s1, %s1391_s14  ;;  %s1742_s22 = scalar_lea.vmem %s1971_s0, %s1390_s19 }
  0x10   : > { %v1696_v1 = vld [vmem:[%s222_s17 + $0x18] sm:$0xff]  ;;  %v1698_v2 = vld [vmem:[%s222_s17 + $0x10] sm:$0xff]  ;;  %v1703_v3 = vld [vmem:[%s222_s17 + $0x8] sm:$0xff]  ;;  %s1364_s23 = sshll.u32 %s1734_s18, 1  ;;  %s1761_s30 = scalar_lea.vmem %s1973_s2, %s1390_s19 }
  0x11   : > { %1434 = vmatpush3.msra.mxu0 %v1696_v1  ;;  %1445 = vmatpush3.msra.mxu1 %v1696_v1  ;;  %v1709_v4 = vld [vmem:[%s222_s17] sm:$0xff]  ;;  %s255_s24 = scalar_lea.vmem %s1742_s22, %s1364_s23  ;;  %s371_s3 = scalar_lea.vmem %s1761_s30, %s1364_s23 }
  0x12   : > { %1435 = vmatprep.subr.mxu0 %v1638_v0  ;;  %1446 = vmatprep.subr.mxu1 %v1638_v0  ;;  %v256_v6 = vld [vmem:[%s255_s24] sm:$0x3]  ;;  %s1781_s4 = scalar_select %p250_p5, 1, 6 }
  0x13   : > { %1436 = vmatpush3.msra.mxu0 %v1698_v2  ;;  %1447 = vmatpush3.msra.mxu1 %v1698_v2  ;;  %s1812_s8 = scalar_select %p250_p5, 2, 5 }
  0x14   : > { %1437 = vmatprep.subr.mxu0 %v1638_v0  ;;  %1448 = vmatprep.subr.mxu1 %v1638_v0  ;;  %v252_v5 = vld [vmem:[#allocation2] sm:$0x3]  ;;  %v253_v11 = vld [vmem:[#allocation3] sm:$0x3]  ;;  %s1367_s5 = sshll.u32 %s1781_s4, 1 }
  0x15   : > { %1438 = vmatpush3.msra.mxu0 %v1703_v3  ;;  %1449 = vmatpush3.msra.mxu1 %v1703_v3  ;;  %s377_s6 = scalar_lea.vmem %s1742_s22, %s1367_s5  ;;  %s491_s7 = scalar_lea.vmem %s1761_s30, %s1367_s5 }
  0x16   : > { %1439 = vmatprep.subr.mxu0 %v1638_v0  ;;  %1450 = vmatprep.subr.mxu1 %v1638_v0  ;;  %v378_v29 = vld [vmem:[%s377_s6] sm:$0x3]  ;;  %s1370_s13 = sshll.u32 %s1812_s8, 1 }
  0x17   : > { %1440 = vmatpush3.msra.mxu0 %v1709_v4  ;;  %1451 = vmatpush3.msra.mxu1 %v1709_v4  ;;  %s497_s14 = scalar_lea.vmem %s1742_s22, %s1370_s13  ;;  %s611_s15 = scalar_lea.vmem %s1761_s30, %s1370_s13 }
  0x18   : > { %1442 = vmatmul.mubr.msk.f32.vlgmr.msra.gmra.mxu0 %vm257_vm2, %v252_v5  ;;  %1455 = vmatprep.subr.mxu0 %v1638_v0  ;;  %v498_v51 = vld [vmem:[%s497_s14] sm:$0x3]  ;;  %s1843_s16 = scalar_select %p250_p5, 3, 4 }
  0x19   : > { %1456 = vmatpush3.msra.mxu0 %v1696_v1  ;;  %1463 = vmatprep.mubr.msk.f32.mxu0 %vm1639_vm1, %v1638_v0  ;;  %s1873_s20 = scalar_select %p250_p5, 4, 3 }
  0x1a   : > { %1457 = vmatprep.subr.mxu0 %v1638_v0  ;;  %1466 = vmatprep.subr.mxu1 %v1638_v0  ;;  %s1373_s17 = sshll.u32 %s1843_s16, 1 }
  0x1b   : > { %1458 = vmatpush3.msra.mxu0 %v1698_v2  ;;  %s617_s18 = scalar_lea.vmem %s1742_s22, %s1373_s17  ;;  %s731_s19 = scalar_lea.vmem %s1761_s30, %s1373_s17 }
  0x1c   : > { %1459 = vmatprep.subr.mxu0 %v1638_v0  ;;  %s1376_s21 = sshll.u32 %s1873_s20, 1 }
  0x1d   : > { %1460 = vmatpush3.msra.mxu0 %v1703_v3  ;;  %s737_s23 = scalar_lea.vmem %s1742_s22, %s1376_s21  ;;  %s851_s24 = scalar_lea.vmem %s1761_s30, %s1376_s21 }
  0x1e   : > { %1461 = vmatprep.subr.mxu0 %v1638_v0  ;;  %s1903_s28 = scalar_select %p250_p5, 5, 2 }
  0x1f   : > { %1462 = vmatpush3.msra.mxu0 %v1709_v4  ;;  %s1924_s5 = scalar_select %p250_p5, 6, 1 }
  0x20   : > { %1477 = vmatprep.subr.mxu0 %v1638_v0  ;;  %s1379_s29 = sshll.u32 %s1903_s28, 1 }
  0x21   : > { %s971_s4 = scalar_lea.vmem %s1761_s30, %s1379_s29  ;;  %s1382_s6 = sshll.u32 %s1924_s5, 1 }
  0x22   : > { %s1091_s8 = scalar_lea.vmem %s1761_s30, %s1382_s6 }
  0x23   : > { %s1945_s13 = scalar_select %p250_p5, 7, 0 }
  0x25   : > { %s1385_s14 = sshll.u32 %s1945_s13, 1 }
  0x26   : > { %s1211_s9 = scalar_lea.vmem %s1761_s30, %s1385_s14 }
  0xd8   : > { %v327_v7 = vpop.f32.mrf.mxu0 }
  0xd9   : > { %v331_v8 = vadd.f32 %v327_v7, %v256_v6 }
  0xda   : > { %v1443_v9 = vpop.f32.mrf.mxu0 }
  0xdb   : > { %1550 = vtanh.f32 %v331_v8  ;;  %v1366_v12 = vmul.f32 -1.442695, %v331_v8 }
  0xdd   : > { %1552 = vpow2.f32 %v1366_v12 }
  0xe8   : > { %v1551_v10 = vpop.eup %1550 }
  0xe9   : > { %345 = vrot.lane.b32.xlu0 %v1551_v10, %s1640_s25 }
  0xea   : > { %v1553_v13 = vpop.eup %1552 }
  0xeb   : > { %v335_v14 = vadd.f32 1.0, %v1553_v13 }
  0xed   : > { %340 = vrot.lane.b32.xlu0 %v253_v11, %s1641_s26  ;;  %1554 = vrcp.f32 %v335_v14  ;;  %v618_v14 = vld [vmem:[%s617_s18] sm:$0x3] }
  0xfa   : > { %v1555_v15 = vpop.eup %1554 }
 0x15b   : > { %v346_v16 = vpop.permute.xlu0 %345 }
 0x15c   : > { %v348_v17 = vmul.f32 %v1555_v15, %v346_v16 }
 0x15e   : > { %350 = vrot.lane.b32.xlu1 %v348_v17, %s1641_s26 }
 0x15f   : > { %v341_v18 = vpop.permute.xlu0 %340 }
 0x160   : > { %v343_v19 = vmul.f32 %v1555_v15, %v341_v18 }
 0x1d0   : > { %v351_v20 = vpop.permute.xlu1 %350 }
 0x1d1   : > { %v353_v21 = vadd.f32 %v351_v20, %v343_v19 }
 0x1d3   : > { %1556 = vtanh.f32 %v353_v21 }
 0x1e0   : > { %v1557_v22 = vpop.eup %1556 }
 0x1e1   : > { %356 = vrot.lane.b32.xlu1 %v1557_v22, %s1640_s25 }
 0x1e5   : > { %367 = vrot.lane.b32.xlu1 %v353_v21, %s1642_s27 }
 0x253   : > { %v357_v23 = vpop.permute.xlu1 %356 }
 0x254   : > { %v359_v24 = vmul.f32 %v1555_v15, %v357_v23 }
 0x256   : > { %361 = vrot.lane.b32.xlu0 %v359_v24, %s1641_s26 }
 0x257   : > { %v368_v25 = vpop.permute.xlu1 %367 }
 0x258   : > { %370 = vst.msk [vmem:[#allocation3] sm:$0x3] %vm243_vm0, %v368_v25 }
 0x25f   : > { %v375_v26 = vld [vmem:[#allocation3] sm:$0x3] }
 0x260   : > { %461 = vrot.lane.b32.xlu1 %v375_v26, %s1641_s26 }
 0x2c8   : > { %v362_v27 = vpop.permute.xlu0 %361 }
 0x2c9   : > { %365 = vst.msk [vmem:[#allocation2] sm:$0x3] %vm243_vm0, %v362_v27  ;;  %372 = vst.msk [vmem:[%s371_s3] sm:$0x3] %vm243_vm0, %v362_v27  ;;  %s857_s3 = scalar_lea.vmem %s1742_s22, %s1379_s29 }
 0x2d0   : > { %v374_v28 = vld [vmem:[#allocation2] sm:$0x3] }
 0x2d1   : > { %1453 = vmatmul.mubr.msk.f32.vlgmr.msra.gmra.mxu1 %vm257_vm2, %v374_v28 }
 0x2d2   : > { %1467 = vmatpush3.msra.mxu1 %v1696_v1  ;;  %1474 = vmatprep.mubr.msk.f32.mxu1 %vm1639_vm1, %v1638_v0  ;;  %v462_v40 = vpop.permute.xlu1 %461 }
 0x2d3   : > { %1468 = vmatprep.subr.mxu1 %v1638_v0 }
 0x2d4   : > { %1469 = vmatpush3.msra.mxu1 %v1698_v2 }
 0x2d5   : > { %1470 = vmatprep.subr.mxu1 %v1638_v0 }
 0x2d6   : > { %1471 = vmatpush3.msra.mxu1 %v1703_v3 }
 0x2d7   : > { %1472 = vmatprep.subr.mxu1 %v1638_v0 }
 0x2d8   : > { %1473 = vmatpush3.msra.mxu1 %v1709_v4 }
 0x2d9   : > { %1488 = vmatprep.subr.mxu1 %v1638_v0 }
 0x391   : > { %v448_v30 = vpop.f32.mrf.mxu1 }
 0x392   : > { %v452_v31 = vadd.f32 %v448_v30, %v378_v29 }
 0x393   : > { %v1454_v32 = vpop.f32.mrf.mxu1 }
 0x394   : > { %1558 = vtanh.f32 %v452_v31  ;;  %v1369_v34 = vmul.f32 -1.442695, %v452_v31 }
 0x396   : > { %1560 = vpow2.f32 %v1369_v34 }
 0x3a1   : > { %v1559_v33 = vpop.eup %1558 }
 0x3a2   : > { %466 = vrot.lane.b32.xlu0 %v1559_v33, %s1640_s25 }
 0x3a3   : > { %v1561_v35 = vpop.eup %1560 }
 0x3a4   : > { %v456_v36 = vadd.f32 1.0, %v1561_v35 }
 0x3a6   : > { %1562 = vrcp.f32 %v456_v36  ;;  %v738_v36 = vld [vmem:[%s737_s23] sm:$0x3] }
 0x3b3   : > { %v1563_v37 = vpop.eup %1562 }
 0x3b4   : > { %v464_v41 = vmul.f32 %v1563_v37, %v462_v40 }
 0x414   : > { %v467_v38 = vpop.permute.xlu0 %466 }
 0x415   : > { %v469_v39 = vmul.f32 %v1563_v37, %v467_v38 }
 0x417   : > { %471 = vrot.lane.b32.xlu0 %v469_v39, %s1641_s26 }
 0x489   : > { %v472_v42 = vpop.permute.xlu0 %471 }
 0x48a   : > { %v474_v43 = vadd.f32 %v472_v42, %v464_v41 }
 0x48c   : > { %1564 = vtanh.f32 %v474_v43 }
 0x499   : > { %v1565_v44 = vpop.eup %1564 }
 0x49a   : > { %477 = vrot.lane.b32.xlu1 %v1565_v44, %s1640_s25 }
 0x49e   : > { %487 = vrot.lane.b32.xlu1 %v474_v43, %s1642_s27 }
 0x50c   : > { %v478_v45 = vpop.permute.xlu1 %477 }
 0x50d   : > { %v480_v46 = vmul.f32 %v1563_v37, %v478_v45 }
 0x50f   : > { %482 = vrot.lane.b32.xlu0 %v480_v46, %s1641_s26 }
 0x510   : > { %v488_v47 = vpop.permute.xlu1 %487 }
 0x511   : > { %490 = vst.msk [vmem:[#allocation3] sm:$0x3] %vm243_vm0, %v488_v47 }
 0x518   : > { %v495_v48 = vld [vmem:[#allocation3] sm:$0x3] }
 0x519   : > { %581 = vrot.lane.b32.xlu1 %v495_v48, %s1641_s26 }
 0x581   : > { %v483_v49 = vpop.permute.xlu0 %482 }
 0x582   : > { %485 = vst.msk [vmem:[#allocation2] sm:$0x3] %vm243_vm0, %v483_v49  ;;  %492 = vst.msk [vmem:[%s491_s7] sm:$0x3] %vm243_vm0, %v483_v49  ;;  %s977_s7 = scalar_lea.vmem %s1742_s22, %s1382_s6 }
 0x589   : > { %v494_v50 = vld [vmem:[#allocation2] sm:$0x3] }
 0x58a   : > { %1464 = vmatmul.mubr.msk.f32.vlgmr.msra.gmra.mxu0 %vm257_vm2, %v494_v50 }
 0x58b   : > { %1478 = vmatpush3.msra.mxu0 %v1696_v1  ;;  %1485 = vmatprep.mubr.msk.f32.mxu0 %vm1639_vm1, %v1638_v0  ;;  %v582_v62 = vpop.permute.xlu1 %581 }
 0x58c   : > { %1479 = vmatprep.subr.mxu0 %v1638_v0 }
 0x58d   : > { %1480 = vmatpush3.msra.mxu0 %v1698_v2 }
 0x58e   : > { %1481 = vmatprep.subr.mxu0 %v1638_v0 }
 0x58f   : > { %1482 = vmatpush3.msra.mxu0 %v1703_v3 }
 0x590   : > { %1483 = vmatprep.subr.mxu0 %v1638_v0 }
 0x591   : > { %1484 = vmatpush3.msra.mxu0 %v1709_v4 }
 0x592   : > { %1499 = vmatprep.subr.mxu0 %v1638_v0 }
 0x64a   : > { %v568_v52 = vpop.f32.mrf.mxu0 }
 0x64b   : > { %v572_v53 = vadd.f32 %v568_v52, %v498_v51 }
 0x64c   : > { %v1465_v54 = vpop.f32.mrf.mxu0 }
 0x64d   : > { %1566 = vtanh.f32 %v572_v53  ;;  %v1372_v56 = vmul.f32 -1.442695, %v572_v53 }
 0x64f   : > { %1568 = vpow2.f32 %v1372_v56 }
 0x65a   : > { %v1567_v55 = vpop.eup %1566 }
 0x65b   : > { %586 = vrot.lane.b32.xlu0 %v1567_v55, %s1640_s25 }
 0x65c   : > { %v1569_v57 = vpop.eup %1568 }
 0x65d   : > { %v576_v58 = vadd.f32 1.0, %v1569_v57 }
 0x65f   : > { %1570 = vrcp.f32 %v576_v58 }
 0x66c   : > { %v1571_v59 = vpop.eup %1570 }
 0x66d   : > { %v584_v63 = vmul.f32 %v1571_v59, %v582_v62 }
 0x6cd   : > { %v587_v60 = vpop.permute.xlu0 %586 }
 0x6ce   : > { %v589_v61 = vmul.f32 %v1571_v59, %v587_v60 }
 0x6d0   : > { %591 = vrot.lane.b32.xlu0 %v589_v61, %s1641_s26 }
 0x742   : > { %v592_v5 = vpop.permute.xlu0 %591 }
 0x743   : > { %v594_v6 = vadd.f32 %v592_v5, %v584_v63 }
 0x745   : > { %1572 = vtanh.f32 %v594_v6 }
 0x752   : > { %v1573_v7 = vpop.eup %1572 }
 0x753   : > { %597 = vrot.lane.b32.xlu1 %v1573_v7, %s1640_s25 }
 0x757   : > { %607 = vrot.lane.b32.xlu1 %v594_v6, %s1642_s27 }
 0x7c5   : > { %v598_v8 = vpop.permute.xlu1 %597 }
 0x7c6   : > { %v600_v9 = vmul.f32 %v1571_v59, %v598_v8 }
 0x7c8   : > { %602 = vrot.lane.b32.xlu0 %v600_v9, %s1641_s26 }
 0x7c9   : > { %v608_v10 = vpop.permute.xlu1 %607 }
 0x7ca   : > { %610 = vst.msk [vmem:[#allocation3] sm:$0x3] %vm243_vm0, %v608_v10 }
 0x7d1   : > { %v615_v11 = vld [vmem:[#allocation3] sm:$0x3] }
 0x7d2   : > { %701 = vrot.lane.b32.xlu1 %v615_v11, %s1641_s26 }
 0x83a   : > { %v603_v12 = vpop.permute.xlu0 %602 }
 0x83b   : > { %605 = vst.msk [vmem:[#allocation2] sm:$0x3] %vm243_vm0, %v603_v12  ;;  %612 = vst.msk [vmem:[%s611_s15] sm:$0x3] %vm243_vm0, %v603_v12  ;;  %s1097_s15 = scalar_lea.vmem %s1742_s22, %s1385_s14 }
 0x842   : > { %v614_v13 = vld [vmem:[#allocation2] sm:$0x3] }
 0x843   : > { %1475 = vmatmul.mubr.msk.f32.vlgmr.msra.gmra.mxu1 %vm257_vm2, %v614_v13 }
 0x844   : > { %1489 = vmatpush3.msra.mxu1 %v1696_v1  ;;  %1496 = vmatprep.mubr.msk.f32.mxu1 %vm1639_vm1, %v1638_v0  ;;  %v702_v25 = vpop.permute.xlu1 %701 }
 0x845   : > { %1490 = vmatprep.subr.mxu1 %v1638_v0 }
 0x846   : > { %1491 = vmatpush3.msra.mxu1 %v1698_v2 }
 0x847   : > { %1492 = vmatprep.subr.mxu1 %v1638_v0 }
 0x848   : > { %1493 = vmatpush3.msra.mxu1 %v1703_v3 }
 0x849   : > { %1494 = vmatprep.subr.mxu1 %v1638_v0 }
 0x84a   : > { %1495 = vmatpush3.msra.mxu1 %v1709_v4 }
 0x84b   : > { %1510 = vmatprep.subr.mxu1 %v1638_v0 }
 0x903   : > { %v688_v15 = vpop.f32.mrf.mxu1 }
 0x904   : > { %v692_v16 = vadd.f32 %v688_v15, %v618_v14 }
 0x905   : > { %v1476_v17 = vpop.f32.mrf.mxu1 }
 0x906   : > { %1574 = vtanh.f32 %v692_v16  ;;  %v1375_v19 = vmul.f32 -1.442695, %v692_v16  ;;  %v978_v16 = vld [vmem:[%s977_s7] sm:$0x3] }
 0x908   : > { %1576 = vpow2.f32 %v1375_v19 }
 0x913   : > { %v1575_v18 = vpop.eup %1574 }
 0x914   : > { %706 = vrot.lane.b32.xlu0 %v1575_v18, %s1640_s25 }
 0x915   : > { %v1577_v20 = vpop.eup %1576 }
 0x916   : > { %v696_v21 = vadd.f32 1.0, %v1577_v20 }
 0x918   : > { %1578 = vrcp.f32 %v696_v21 }
 0x925   : > { %v1579_v22 = vpop.eup %1578 }
 0x926   : > { %v704_v26 = vmul.f32 %v1579_v22, %v702_v25 }
 0x986   : > { %v707_v23 = vpop.permute.xlu0 %706 }
 0x987   : > { %v709_v24 = vmul.f32 %v1579_v22, %v707_v23 }
 0x989   : > { %711 = vrot.lane.b32.xlu0 %v709_v24, %s1641_s26 }
 0x9fb   : > { %v712_v27 = vpop.permute.xlu0 %711 }
 0x9fc   : > { %v714_v28 = vadd.f32 %v712_v27, %v704_v26 }
 0x9fe   : > { %1580 = vtanh.f32 %v714_v28 }
 0xa0b   : > { %v1581_v29 = vpop.eup %1580 }
 0xa0c   : > { %717 = vrot.lane.b32.xlu1 %v1581_v29, %s1640_s25 }
 0xa10   : > { %727 = vrot.lane.b32.xlu1 %v714_v28, %s1642_s27 }
 0xa7e   : > { %v718_v30 = vpop.permute.xlu1 %717 }
 0xa7f   : > { %v720_v31 = vmul.f32 %v1579_v22, %v718_v30 }
 0xa81   : > { %722 = vrot.lane.b32.xlu0 %v720_v31, %s1641_s26 }
 0xa82   : > { %v728_v32 = vpop.permute.xlu1 %727 }
 0xa83   : > { %730 = vst.msk [vmem:[#allocation3] sm:$0x3] %vm243_vm0, %v728_v32 }
 0xa8a   : > { %v735_v33 = vld [vmem:[#allocation3] sm:$0x3] }
 0xa8b   : > { %821 = vrot.lane.b32.xlu1 %v735_v33, %s1641_s26 }
 0xaf3   : > { %v723_v34 = vpop.permute.xlu0 %722 }
 0xaf4   : > { %725 = vst.msk [vmem:[#allocation2] sm:$0x3] %vm243_vm0, %v723_v34  ;;  %732 = vst.msk [vmem:[%s731_s19] sm:$0x3] %vm243_vm0, %v723_v34 }
 0xafb   : > { %v734_v35 = vld [vmem:[#allocation2] sm:$0x3] }
 0xafc   : > { %1486 = vmatmul.mubr.msk.f32.vlgmr.msra.gmra.mxu0 %vm257_vm2, %v734_v35 }
 0xafd   : > { %1500 = vmatpush3.msra.mxu0 %v1696_v1  ;;  %1507 = vmatprep.mubr.msk.f32.mxu0 %vm1639_vm1, %v1638_v0  ;;  %v822_v47 = vpop.permute.xlu1 %821 }
 0xafe   : > { %1501 = vmatprep.subr.mxu0 %v1638_v0 }
 0xaff   : > { %1502 = vmatpush3.msra.mxu0 %v1698_v2 }
 0xb00   : > { %1503 = vmatprep.subr.mxu0 %v1638_v0 }
 0xb01   : > { %1504 = vmatpush3.msra.mxu0 %v1703_v3 }
 0xb02   : > { %1505 = vmatprep.subr.mxu0 %v1638_v0 }
 0xb03   : > { %1506 = vmatpush3.msra.mxu0 %v1709_v4 }
 0xbbc   : > { %v808_v37 = vpop.f32.mrf.mxu0 }
 0xbbd   : > { %v812_v38 = vadd.f32 %v808_v37, %v738_v36 }
 0xbbe   : > { %v1487_v39 = vpop.f32.mrf.mxu0 }
 0xbbf   : > { %1582 = vtanh.f32 %v812_v38  ;;  %v1378_v41 = vmul.f32 -1.442695, %v812_v38  ;;  %v1098_v38 = vld [vmem:[%s1097_s15] sm:$0x3] }
 0xbc1   : > { %1584 = vpow2.f32 %v1378_v41 }
 0xbcc   : > { %v1583_v40 = vpop.eup %1582 }
 0xbcd   : > { %826 = vrot.lane.b32.xlu0 %v1583_v40, %s1640_s25 }
 0xbce   : > { %v1585_v42 = vpop.eup %1584 }
 0xbcf   : > { %v816_v43 = vadd.f32 1.0, %v1585_v42 }
 0xbd1   : > { %1586 = vrcp.f32 %v816_v43 }
 0xbde   : > { %v1587_v44 = vpop.eup %1586 }
 0xbdf   : > { %v824_v48 = vmul.f32 %v1587_v44, %v822_v47 }
 0xc3f   : > { %v827_v45 = vpop.permute.xlu0 %826 }
 0xc40   : > { %v829_v46 = vmul.f32 %v1587_v44, %v827_v45 }
 0xc42   : > { %831 = vrot.lane.b32.xlu0 %v829_v46, %s1641_s26 }
 0xcb4   : > { %v832_v49 = vpop.permute.xlu0 %831 }
 0xcb5   : > { %v834_v50 = vadd.f32 %v832_v49, %v824_v48 }
 0xcb7   : > { %1588 = vtanh.f32 %v834_v50 }
 0xcc4   : > { %v1589_v51 = vpop.eup %1588 }
 0xcc5   : > { %837 = vrot.lane.b32.xlu1 %v1589_v51, %s1640_s25 }
 0xcc9   : > { %847 = vrot.lane.b32.xlu1 %v834_v50, %s1642_s27 }
 0xd37   : > { %v838_v52 = vpop.permute.xlu1 %837 }
 0xd38   : > { %v840_v53 = vmul.f32 %v1587_v44, %v838_v52 }
 0xd3a   : > { %842 = vrot.lane.b32.xlu0 %v840_v53, %s1641_s26 }
 0xd3b   : > { %v848_v54 = vpop.permute.xlu1 %847 }
 0xd3c   : > { %850 = vst.msk [vmem:[#allocation3] sm:$0x3] %vm243_vm0, %v848_v54 }
 0xd43   : > { %v855_v55 = vld [vmem:[#allocation3] sm:$0x3] }
 0xd44   : > { %941 = vrot.lane.b32.xlu1 %v855_v55, %s1641_s26 }
 0xdac   : > { %v843_v56 = vpop.permute.xlu0 %842 }
 0xdad   : > { %845 = vst.msk [vmem:[#allocation2] sm:$0x3] %vm243_vm0, %v843_v56  ;;  %852 = vst.msk [vmem:[%s851_s24] sm:$0x3] %vm243_vm0, %v843_v56 }
 0xdb4   : > { %v854_v57 = vld [vmem:[#allocation2] sm:$0x3] }
 0xdb5   : > { %1497 = vmatmul.mubr.msk.f32.vlgmr.msra.gmra.mxu1 %vm257_vm2, %v854_v57 }
 0xdb6   : > { %1511 = vmatpush3.msra.mxu1 %v1696_v1  ;;  %1518 = vmatprep.mubr.msk.f32.mxu1 %vm1639_vm1, %v1638_v0  ;;  %v858_v1 = vld [vmem:[%s857_s3] sm:$0x3]  ;;  %v942_v5 = vpop.permute.xlu1 %941 }
 0xdb7   : > { %1512 = vmatprep.subr.mxu1 %v1638_v0 }
 0xdb8   : > { %1513 = vmatpush3.msra.mxu1 %v1698_v2 }
 0xdb9   : > { %1514 = vmatprep.subr.mxu1 %v1638_v0 }
 0xdba   : > { %1515 = vmatpush3.msra.mxu1 %v1703_v3 }
 0xdbb   : > { %1516 = vmatprep.subr.mxu1 %v1638_v0 }
 0xdbc   : > { %1517 = vmatpush3.msra.mxu1 %v1709_v4 }
 0xe75   : > { %v928_v58 = vpop.f32.mrf.mxu1 }
 0xe76   : > { %v932_v59 = vadd.f32 %v928_v58, %v858_v1 }
 0xe77   : > { %v1498_v2 = vpop.f32.mrf.mxu1 }
 0xe78   : > { %1590 = vtanh.f32 %v932_v59  ;;  %v1381_v3 = vmul.f32 -1.442695, %v932_v59 }
 0xe7a   : > { %1592 = vpow2.f32 %v1381_v3 }
 0xe85   : > { %v1591_v60 = vpop.eup %1590 }
 0xe86   : > { %946 = vrot.lane.b32.xlu0 %v1591_v60, %s1640_s25 }
 0xe87   : > { %v1593_v0 = vpop.eup %1592 }
 0xe88   : > { %v936_v4 = vadd.f32 1.0, %v1593_v0 }
 0xe8a   : > { %1594 = vrcp.f32 %v936_v4 }
 0xe97   : > { %v1595_v61 = vpop.eup %1594 }
 0xe98   : > { %v944_v6 = vmul.f32 %v1595_v61, %v942_v5 }
 0xef8   : > { %v947_v62 = vpop.permute.xlu0 %946 }
 0xef9   : > { %v949_v63 = vmul.f32 %v1595_v61, %v947_v62 }
 0xefb   : > { %951 = vrot.lane.b32.xlu0 %v949_v63, %s1641_s26 }
 0xf6d   : > { %v952_v7 = vpop.permute.xlu0 %951 }
 0xf6e   : > { %v954_v8 = vadd.f32 %v952_v7, %v944_v6 }
 0xf70   : > { %1596 = vtanh.f32 %v954_v8 }
 0xf7d   : > { %v1597_v9 = vpop.eup %1596 }
 0xf7e   : > { %957 = vrot.lane.b32.xlu1 %v1597_v9, %s1640_s25 }
 0xf82   : > { %967 = vrot.lane.b32.xlu1 %v954_v8, %s1642_s27 }
 0xff0   : > { %v958_v10 = vpop.permute.xlu1 %957 }
 0xff1   : > { %v960_v11 = vmul.f32 %v1595_v61, %v958_v10 }
 0xff3   : > { %962 = vrot.lane.b32.xlu0 %v960_v11, %s1641_s26 }
 0xff4   : > { %v968_v12 = vpop.permute.xlu1 %967 }
 0xff5   : > { %970 = vst.msk [vmem:[#allocation3] sm:$0x3] %vm243_vm0, %v968_v12 }
 0xffc   : > { %v975_v13 = vld [vmem:[#allocation3] sm:$0x3] }
 0xffd   : > { %1061 = vrot.lane.b32.xlu1 %v975_v13, %s1641_s26 }
0x1065   : > { %v963_v14 = vpop.permute.xlu0 %962 }
0x1066   : > { %965 = vst.msk [vmem:[#allocation2] sm:$0x3] %vm243_vm0, %v963_v14  ;;  %972 = vst.msk [vmem:[%s971_s4] sm:$0x3] %vm243_vm0, %v963_v14 }
0x106d   : > { %v974_v15 = vld [vmem:[#allocation2] sm:$0x3] }
0x106e   : > { %1508 = vmatmul.mubr.msk.f32.vlgmr.msra.gmra.mxu0 %vm257_vm2, %v974_v15 }
0x106f   : > { %v1062_v27 = vpop.permute.xlu1 %1061 }
0x112e   : > { %v1048_v17 = vpop.f32.mrf.mxu0 }
0x112f   : > { %v1052_v18 = vadd.f32 %v1048_v17, %v978_v16 }
0x1130   : > { %v1509_v19 = vpop.f32.mrf.mxu0 }
0x1131   : > { %1598 = vtanh.f32 %v1052_v18  ;;  %v1384_v21 = vmul.f32 -1.442695, %v1052_v18 }
0x1133   : > { %1600 = vpow2.f32 %v1384_v21 }
0x113e   : > { %v1599_v20 = vpop.eup %1598 }
0x113f   : > { %1066 = vrot.lane.b32.xlu0 %v1599_v20, %s1640_s25 }
0x1140   : > { %v1601_v22 = vpop.eup %1600 }
0x1141   : > { %v1056_v23 = vadd.f32 1.0, %v1601_v22 }
0x1143   : > { %1602 = vrcp.f32 %v1056_v23 }
0x1150   : > { %v1603_v24 = vpop.eup %1602 }
0x1151   : > { %v1064_v28 = vmul.f32 %v1603_v24, %v1062_v27 }
0x11b1   : > { %v1067_v25 = vpop.permute.xlu0 %1066 }
0x11b2   : > { %v1069_v26 = vmul.f32 %v1603_v24, %v1067_v25 }
0x11b4   : > { %1071 = vrot.lane.b32.xlu0 %v1069_v26, %s1641_s26 }
0x1226   : > { %v1072_v29 = vpop.permute.xlu0 %1071 }
0x1227   : > { %v1074_v30 = vadd.f32 %v1072_v29, %v1064_v28 }
0x1229   : > { %1604 = vtanh.f32 %v1074_v30 }
0x1236   : > { %v1605_v31 = vpop.eup %1604 }
0x1237   : > { %1077 = vrot.lane.b32.xlu1 %v1605_v31, %s1640_s25 }
0x123b   : > { %1087 = vrot.lane.b32.xlu1 %v1074_v30, %s1642_s27 }
0x12a9   : > { %v1078_v32 = vpop.permute.xlu1 %1077 }
0x12aa   : > { %v1080_v33 = vmul.f32 %v1603_v24, %v1078_v32 }
0x12ac   : > { %1082 = vrot.lane.b32.xlu0 %v1080_v33, %s1641_s26 }
0x12ad   : > { %v1088_v34 = vpop.permute.xlu1 %1087 }
0x12ae   : > { %1090 = vst.msk [vmem:[#allocation3] sm:$0x3] %vm243_vm0, %v1088_v34 }
0x12b5   : > { %v1095_v35 = vld [vmem:[#allocation3] sm:$0x3] }
0x12b6   : > { %1181 = vrot.lane.b32.xlu1 %v1095_v35, %s1641_s26 }
0x131e   : > { %v1083_v36 = vpop.permute.xlu0 %1082 }
0x131f   : > { %1085 = vst.msk [vmem:[#allocation2] sm:$0x3] %vm243_vm0, %v1083_v36  ;;  %1092 = vst.msk [vmem:[%s1091_s8] sm:$0x3] %vm243_vm0, %v1083_v36 }
0x1326   : > { %v1094_v37 = vld [vmem:[#allocation2] sm:$0x3] }
0x1327   : > { %1519 = vmatmul.mubr.msk.f32.vlgmr.msra.gmra.mxu1 %vm257_vm2, %v1094_v37 }
0x1328   : > { %v1182_v49 = vpop.permute.xlu1 %1181 }
0x13e7   : > { %v1168_v39 = vpop.f32.mrf.mxu1 }
0x13e8   : > { %v1172_v40 = vadd.f32 %v1168_v39, %v1098_v38 }
0x13e9   : > { %v1520_v41 = vpop.f32.mrf.mxu1 }
0x13ea   : > { %1606 = vtanh.f32 %v1172_v40  ;;  %v1387_v43 = vmul.f32 -1.442695, %v1172_v40 }
0x13ec   : > { %1608 = vpow2.f32 %v1387_v43 }
0x13f7   : > { %v1607_v42 = vpop.eup %1606 }
0x13f8   : > { %1186 = vrot.lane.b32.xlu0 %v1607_v42, %s1640_s25 }
0x13f9   : > { %v1609_v44 = vpop.eup %1608 }
0x13fa   : > { %v1176_v45 = vadd.f32 1.0, %v1609_v44 }
0x13fc   : > { %1610 = vrcp.f32 %v1176_v45 }
0x1409   : > { %v1611_v46 = vpop.eup %1610 }
0x140a   : > { %v1184_v50 = vmul.f32 %v1611_v46, %v1182_v49 }
0x146a   : > { %v1187_v47 = vpop.permute.xlu0 %1186 }
0x146b   : > { %v1189_v48 = vmul.f32 %v1611_v46, %v1187_v47 }
0x146d   : > { %1191 = vrot.lane.b32.xlu0 %v1189_v48, %s1641_s26 }
0x14df   : > { %v1192_v51 = vpop.permute.xlu0 %1191 }
0x14e0   : > { %v1194_v52 = vadd.f32 %v1192_v51, %v1184_v50 }
0x14e2   : > { %1612 = vtanh.f32 %v1194_v52 }
0x14ef   : > { %v1613_v53 = vpop.eup %1612 }
0x14f0   : > { %1197 = vrot.lane.b32.xlu1 %v1613_v53, %s1640_s25 }
0x14f4   : > { %1207 = vrot.lane.b32.xlu1 %v1194_v52, %s1642_s27 }
0x1562   : > { %v1198_v54 = vpop.permute.xlu1 %1197 }
0x1563   : > { %v1200_v55 = vmul.f32 %v1611_v46, %v1198_v54 }
0x1565   : > { %1202 = vrot.lane.b32.xlu0 %v1200_v55, %s1641_s26 }
0x1566   : > { %v1208_v56 = vpop.permute.xlu1 %1207 }
0x1567   : > { %1210 = vst.msk [vmem:[#allocation3] sm:$0x3] %vm243_vm0, %v1208_v56 }
0x15d7   : > { %v1203_v57 = vpop.permute.xlu0 %1202 }
0x15d8   : > { %1205 = vst.msk [vmem:[#allocation2] sm:$0x3] %vm243_vm0, %v1203_v57  ;;  %1212 = vst.msk [vmem:[%s1211_s9] sm:$0x3] %vm243_vm0, %v1203_v57 }
0x15d9 PF: > { %s12_s11 = sadd.s32 1, %s1636_s11   ;;  %s1974_s9 = smov %s1632_s10 }
0x15da   : > { %p9_p6 = scmp.ge.s32.totalorder %s12_s11, 4   ;;  %s1975_s10 = smov %s1977_s12 }
0x15dc   :  { %11 = sbr.rel (!%p9_p6) target bundleno = 2 (0x2), region = 81 }

</bundles_post_ra>
